<compile_context>
chip_gen: v6e
topology: v6e:2x2x1
jax: 0.10.0
libtpu: 0.0.40
codegen_flags: <defaults>
</compile_context>

<pallas_src>
import functools

import jax
import jax.numpy as jnp
from jax.experimental import pallas as pl
from jax.experimental.pallas import tpu as pltpu


# ----------------------------------------------------------------------------
# Fused kernel factory.
# Ref order: x_flat, (wi_0, wh_0), ..., (wi_{L-1}, wh_{L-1}), w1t, w2row,
#            o_ref, feat_scr
#   x_flat  : (T*B, D)  time-major-flattened input (row = t*B + b)
#   wi_l    : (in_l, 3H)   columns ordered [r | z | n]   (= W_i^T of nn.GRU)
#   wh_l    : (H, 3H)      columns ordered [r | z | n]   (= W_h^T of nn.GRU)
#   w1t     : (H, C)       first classifier linear, transposed
#   w2row   : (1, C)       second classifier linear weight (PyTorch shape)
#   o_ref   : (B, T)       output logits (matches .squeeze(-1) of the module)
#   feat_scr: (T*B, H)     VMEM scratch holding one layer's output sequence
# ----------------------------------------------------------------------------
def _make_fused_kernel(num_layers, T, B, H):
    def kernel(*refs):
        x_ref = refs[0]
        w_refs = refs[1:1 + 2 * num_layers]
        w1t_ref = refs[1 + 2 * num_layers]
        w2_ref = refs[2 + 2 * num_layers]
        o_ref = refs[3 + 2 * num_layers]
        feat_scr = refs[4 + 2 * num_layers]

        w1t = w1t_ref[...]                 # (H, C)
        w2row = w2_ref[...]                # (1, C)

        layer_in = x_ref[...]              # (T*B, D) for layer 0
        for layer in range(num_layers):
            wi = w_refs[2 * layer][...]        # (in, 3H)
            wh = w_refs[2 * layer + 1][...]    # (H, 3H)

            # Hoisted input-side projection for the whole sequence:
            # one (T*B, in) x (in, 3H) MXU matmul instead of 3 per timestep.
            gi = jnp.dot(layer_in, wi, preferred_element_type=jnp.float32)

            h = jnp.zeros((B, H), jnp.float32)
            for t in range(T):                 # static unroll (T is small)
                gh = jnp.dot(h, wh, preferred_element_type=jnp.float32)  # (B,3H)
                gi_t = gi[t * B:(t + 1) * B, :]                          # (B,3H)
                r = jax.nn.sigmoid(gi_t[:, 0:H] + gh[:, 0:H])
                z = jax.nn.sigmoid(gi_t[:, H:2 * H] + gh[:, H:2 * H])
                n = jnp.tanh(gi_t[:, 2 * H:3 * H] + r * gh[:, 2 * H:3 * H])
                h = (1.0 - z) * n + z * h
                # Stage this layer's outputs (time-major flat) for the next
                # layer's hoisted projection / the batched classifier matmul.
                feat_scr[t * B:(t + 1) * B, :] = h

            layer_in = feat_scr[...]           # (T*B, H)

        # Classifier: Linear(H->C, no bias) -> ReLU -> <., w2> (VPU reduce).
        hidden = jnp.maximum(
            jnp.dot(layer_in, w1t, preferred_element_type=jnp.float32), 0.0)
        logits = jnp.sum(hidden * w2row, axis=-1, keepdims=True)   # (T*B, 1)

        # Write output directly in (B, T): column t <- batch rows at time t.
        for t in range(T):
            o_ref[:, t:t + 1] = logits[t * B:(t + 1) * B, :]

    return kernel


# ----------------------------------------------------------------------------
# Wrapper: builds specs, flattens x to time-major, one pallas_call.
# ----------------------------------------------------------------------------
@jax.jit
def author_classifier_forward(x, wi_list, wh_list, w1t, w2row):
    """x: (B, T, D) batch-first (PyTorch layout).  Returns (B, T)."""
    B, T, D = x.shape
    H = wh_list[0].shape[0]
    C = w1t.shape[1]
    num_layers = len(wi_list)

    # Time-major flatten: row index = t*B + b (cheap, tiny array).
    x_flat = jnp.transpose(x, (1, 0, 2)).reshape(T * B, D)

    full = lambda shape: pl.BlockSpec(shape, lambda i: (0,) * len(shape))

    in_specs = [full((T * B, D))]
    operands = [x_flat]
    for wi, wh in zip(wi_list, wh_list):
        in_specs += [full(wi.shape), full(wh.shape)]
        operands += [wi, wh]
    in_specs += [full((H, C)), full((1, C))]
    operands += [w1t, w2row]

    # Advisory cost estimate for XLA's scheduler.
    flops = 0
    for layer in range(num_layers):
        in_dim = D if layer == 0 else H
        flops += 2 * T * B * in_dim * 3 * H      # hoisted input projection
        flops += 2 * T * B * H * 3 * H           # recurrence matmuls
        flops += 10 * T * B * H                  # gate elementwise (approx)
    flops += 2 * T * B * H * C + 2 * T * B * C   # classifier
    transcendentals = 3 * T * B * H * num_layers
    bytes_accessed = 4 * (x_flat.size + sum(w.size for w in operands[1:]) + B * T)

    kernel = _make_fused_kernel(num_layers, T, B, H)
    return pl.pallas_call(
        kernel,
        grid=(1,),
        out_shape=jax.ShapeDtypeStruct((B, T), jnp.float32),
        in_specs=in_specs,
        out_specs=full((B, T)),
        scratch_shapes=[pltpu.VMEM((T * B, H), jnp.float32)],
        compiler_params=pltpu.CompilerParams(
            dimension_semantics=("arbitrary",)),
        cost_estimate=pl.CostEstimate(
            flops=flops,
            transcendentals=transcendentals,
            bytes_accessed=bytes_accessed),
    )(*operands)


# ----------------------------------------------------------------------------
# Pure-JAX reference (same concatenated-weight parameterization).
# ----------------------------------------------------------------------------
def reference_forward(x, wi_list, wh_list, w1t, w2row):
    B, T, D = x.shape
    h_seq = jnp.transpose(x, (1, 0, 2))        # (T, B, D)
    for wi, wh in zip(wi_list, wh_list):
        H = wh.shape[0]
        h = jnp.zeros((B, H), jnp.float32)
        outs = []
        for t in range(T):
            x_t = h_seq[t]
            gi = x_t @ wi
            gh = h @ wh
            r = jax.nn.sigmoid(gi[:, 0:H] + gh[:, 0:H])
            z = jax.nn.sigmoid(gi[:, H:2 * H] + gh[:, H:2 * H])
            n = jnp.tanh(gi[:, 2 * H:3 * H] + r * gh[:, 2 * H:3 * H])
            h = (1.0 - z) * n + z * h
            outs.append(h)
        h_seq = jnp.stack(outs, axis=0)        # (T, B, H)
    hidden = jnp.maximum(h_seq @ w1t, 0.0)     # (T, B, C)
    out = jnp.sum(hidden * w2row, axis=-1)     # (T, B)
    return out.transpose(1, 0)                 # (B, T)


# ----------------------------------------------------------------------------
# Deterministic parameters (uniform(-1/sqrt(H), 1/sqrt(H)), like nn.GRU /
# nn.Linear default init), stored pre-transposed and gate-concatenated [r|z|n].
# ----------------------------------------------------------------------------
def init_params(key, emb_dim, hidden, cls_hidden, num_layers):
    k = float(1.0 / jnp.sqrt(jnp.float32(hidden)))
    wi_list, wh_list = [], []
    for layer in range(num_layers):
        in_dim = emb_dim if layer == 0 else hidden
        key, k1, k2 = jax.random.split(key, 3)
        wi_list.append(jax.random.uniform(k1, (in_dim, 3 * hidden),
                                          jnp.float32, -k, k))
        wh_list.append(jax.random.uniform(k2, (hidden, 3 * hidden),
                                          jnp.float32, -k, k))
    key, k1, k2 = jax.random.split(key, 3)
    w1t = jax.random.uniform(k1, (hidden, cls_hidden), jnp.float32, -k, k)
    k2s = float(1.0 / jnp.sqrt(jnp.float32(cls_hidden)))
    w2row = jax.random.uniform(k2, (1, cls_hidden), jnp.float32, -k2s, k2s)
    return tuple(wi_list), tuple(wh_list), w1t, w2row


if __name__ == "__main__":
    # Small, module-consistent shapes: batch=2, seq=8, emb_dim=32,
    # extractor_hidden=32, classifier_hidden=16, extractor_num_layers=2.
    B, T = 2, 8
    EMB, HID, CLS_HID, NUM_LAYERS = 32, 32, 16, 2

    key = jax.random.PRNGKey(0)
    key, xkey = jax.random.split(key)
    x = jax.random.normal(xkey, (B, T, EMB), jnp.float32)

    wi_list, wh_list, w1t, w2row = init_params(key, EMB, HID, CLS_HID, NUM_LAYERS)

    out = author_classifier_forward(x, wi_list, wh_list, w1t, w2row)
    out = jax.block_until_ready(out)

    ref = reference_forward(x, wi_list, wh_list, w1t, w2row)
    assert out.shape == (B, T), out.shape
    assert jnp.allclose(out, ref, atol=1e-5, rtol=1e-5), (
        "mismatch vs reference: max abs err "
        f"{float(jnp.max(jnp.abs(out - ref)))}"
    )

    print("KERNEL_OK")
</pallas_src>

<mosaic_0001>
module attributes {stable_mosaic.version = 11 : i64} {
  func.func @kernel(%arg0: i32, %arg1: memref<16x32xf32, #tpu.memory_space<vmem>>, %arg2: memref<32x96xf32, #tpu.memory_space<vmem>>, %arg3: memref<32x96xf32, #tpu.memory_space<vmem>>, %arg4: memref<32x96xf32, #tpu.memory_space<vmem>>, %arg5: memref<32x96xf32, #tpu.memory_space<vmem>>, %arg6: memref<32x16xf32, #tpu.memory_space<vmem>>, %arg7: memref<1x16xf32, #tpu.memory_space<vmem>>, %arg8: memref<2x8xf32, #tpu.memory_space<vmem>>, %arg9: memref<16x32xf32, #tpu.memory_space<vmem>>) attributes {dimension_semantics = [#tpu.dimension_semantics<arbitrary>], iteration_bounds = array<i64: 1>, scalar_prefetch = 0 : i64, scratch_operands = 1 : i64, tpu.core_type = #tpu.core_type<tc>, window_params = [{pipeline_mode = #tpu.pipeline_mode<synchronous>, transform_indices = @transform_0, window_bounds = array<i64: 16, 32>}, {pipeline_mode = #tpu.pipeline_mode<synchronous>, transform_indices = @transform_1, window_bounds = array<i64: 32, 96>}, {pipeline_mode = #tpu.pipeline_mode<synchronous>, transform_indices = @transform_2, window_bounds = array<i64: 32, 96>}, {pipeline_mode = #tpu.pipeline_mode<synchronous>, transform_indices = @transform_3, window_bounds = array<i64: 32, 96>}, {pipeline_mode = #tpu.pipeline_mode<synchronous>, transform_indices = @transform_4, window_bounds = array<i64: 32, 96>}, {pipeline_mode = #tpu.pipeline_mode<synchronous>, transform_indices = @transform_5, window_bounds = array<i64: 32, 16>}, {pipeline_mode = #tpu.pipeline_mode<synchronous>, transform_indices = @transform_6, window_bounds = array<i64: 1, 16>}, {pipeline_mode = #tpu.pipeline_mode<synchronous>, transform_indices = @transform_7, window_bounds = array<i64: 2, 8>}]} {
    %c0 = arith.constant 0 : index
    %c0_0 = arith.constant 0 : index
    %0 = vector.load %arg6[%c0, %c0_0] : memref<32x16xf32, #tpu.memory_space<vmem>>, vector<32x16xf32>
    %c0_1 = arith.constant 0 : index
    %c0_2 = arith.constant 0 : index
    %1 = vector.load %arg7[%c0_1, %c0_2] : memref<1x16xf32, #tpu.memory_space<vmem>>, vector<1x16xf32>
    %c0_3 = arith.constant 0 : index
    %c0_4 = arith.constant 0 : index
    %2 = vector.load %arg1[%c0_3, %c0_4] : memref<16x32xf32, #tpu.memory_space<vmem>>, vector<16x32xf32>
    %c0_5 = arith.constant 0 : index
    %c0_6 = arith.constant 0 : index
    %3 = vector.load %arg2[%c0_5, %c0_6] : memref<32x96xf32, #tpu.memory_space<vmem>>, vector<32x96xf32>
    %c0_7 = arith.constant 0 : index
    %c0_8 = arith.constant 0 : index
    %4 = vector.load %arg3[%c0_7, %c0_8] : memref<32x96xf32, #tpu.memory_space<vmem>>, vector<32x96xf32>
    %cst = arith.constant dense<0.000000e+00> : vector<16x96xf32>
    %5 = tpu.matmul %2, %3, %cst {dimension_numbers = #tpu.dot_dimension_numbers<[1], [0], [0], [1], [0, 0, 1, 1], [], []>} : vector<16x32xf32>, vector<32x96xf32>, vector<16x96xf32> -> vector<16x96xf32>
    %cst_9 = arith.constant 0.000000e+00 : f32
    %6 = vector.broadcast %cst_9 : f32 to vector<2x32xf32>
    %cst_10 = arith.constant dense<0.000000e+00> : vector<2x96xf32>
    %7 = tpu.matmul %6, %4, %cst_10 {dimension_numbers = #tpu.dot_dimension_numbers<[1], [0], [0], [1], [0, 0, 1, 1], [], []>} : vector<2x32xf32>, vector<32x96xf32>, vector<2x96xf32> -> vector<2x96xf32>
    %8 = vector.extract_strided_slice %5 {offsets = [0, 0], sizes = [2, 96], strides = [1, 1]} : vector<16x96xf32> to vector<2x96xf32>
    %9 = vector.extract_strided_slice %8 {offsets = [0, 0], sizes = [2, 32], strides = [1, 1]} : vector<2x96xf32> to vector<2x32xf32>
    %10 = vector.extract_strided_slice %7 {offsets = [0, 0], sizes = [2, 32], strides = [1, 1]} : vector<2x96xf32> to vector<2x32xf32>
    %11 = arith.addf %9, %10 : vector<2x32xf32>
    %12 = arith.negf %11 : vector<2x32xf32>
    %13 = math.exp %12 : vector<2x32xf32>
    %cst_11 = arith.constant 1.000000e+00 : f32
    %14 = vector.broadcast %cst_11 : f32 to vector<2x32xf32>
    %15 = arith.addf %14, %13 : vector<2x32xf32>
    %16 = arith.divf %14, %15 : vector<2x32xf32>
    %17 = vector.extract_strided_slice %8 {offsets = [0, 32], sizes = [2, 32], strides = [1, 1]} : vector<2x96xf32> to vector<2x32xf32>
    %18 = vector.extract_strided_slice %7 {offsets = [0, 32], sizes = [2, 32], strides = [1, 1]} : vector<2x96xf32> to vector<2x32xf32>
    %19 = arith.addf %17, %18 : vector<2x32xf32>
    %20 = arith.negf %19 : vector<2x32xf32>
    %21 = math.exp %20 : vector<2x32xf32>
    %cst_12 = arith.constant 1.000000e+00 : f32
    %22 = vector.broadcast %cst_12 : f32 to vector<2x32xf32>
    %23 = arith.addf %22, %21 : vector<2x32xf32>
    %24 = arith.divf %22, %23 : vector<2x32xf32>
    %25 = vector.extract_strided_slice %8 {offsets = [0, 64], sizes = [2, 32], strides = [1, 1]} : vector<2x96xf32> to vector<2x32xf32>
    %26 = vector.extract_strided_slice %7 {offsets = [0, 64], sizes = [2, 32], strides = [1, 1]} : vector<2x96xf32> to vector<2x32xf32>
    %27 = arith.mulf %16, %26 : vector<2x32xf32>
    %28 = arith.addf %25, %27 : vector<2x32xf32>
    %29 = math.tanh %28 : vector<2x32xf32>
    %cst_13 = arith.constant 1.000000e+00 : f32
    %30 = vector.broadcast %cst_13 : f32 to vector<2x32xf32>
    %31 = arith.subf %30, %24 : vector<2x32xf32>
    %32 = arith.mulf %31, %29 : vector<2x32xf32>
    %33 = arith.mulf %24, %6 : vector<2x32xf32>
    %34 = arith.addf %32, %33 : vector<2x32xf32>
    %c0_14 = arith.constant 0 : index
    %c0_15 = arith.constant 0 : index
    %35 = vector.load %arg9[%c0_14, %c0_15] : memref<16x32xf32, #tpu.memory_space<vmem>>, vector<2x32xf32>
    tpu.vector_store %arg9[%c0_14, %c0_15], %34 {strides = array<i32>} : memref<16x32xf32, #tpu.memory_space<vmem>>, vector<2x32xf32>,
    %cst_16 = arith.constant dense<0.000000e+00> : vector<2x96xf32>
    %36 = tpu.matmul %34, %4, %cst_16 {dimension_numbers = #tpu.dot_dimension_numbers<[1], [0], [0], [1], [0, 0, 1, 1], [], []>} : vector<2x32xf32>, vector<32x96xf32>, vector<2x96xf32> -> vector<2x96xf32>
    %37 = vector.extract_strided_slice %5 {offsets = [2, 0], sizes = [2, 96], strides = [1, 1]} : vector<16x96xf32> to vector<2x96xf32>
    %38 = vector.extract_strided_slice %37 {offsets = [0, 0], sizes = [2, 32], strides = [1, 1]} : vector<2x96xf32> to vector<2x32xf32>
    %39 = vector.extract_strided_slice %36 {offsets = [0, 0], sizes = [2, 32], strides = [1, 1]} : vector<2x96xf32> to vector<2x32xf32>
    %40 = arith.addf %38, %39 : vector<2x32xf32>
    %41 = arith.negf %40 : vector<2x32xf32>
    %42 = math.exp %41 : vector<2x32xf32>
    %cst_17 = arith.constant 1.000000e+00 : f32
    %43 = vector.broadcast %cst_17 : f32 to vector<2x32xf32>
    %44 = arith.addf %43, %42 : vector<2x32xf32>
    %45 = arith.divf %43, %44 : vector<2x32xf32>
    %46 = vector.extract_strided_slice %37 {offsets = [0, 32], sizes = [2, 32], strides = [1, 1]} : vector<2x96xf32> to vector<2x32xf32>
    %47 = vector.extract_strided_slice %36 {offsets = [0, 32], sizes = [2, 32], strides = [1, 1]} : vector<2x96xf32> to vector<2x32xf32>
    %48 = arith.addf %46, %47 : vector<2x32xf32>
    %49 = arith.negf %48 : vector<2x32xf32>
    %50 = math.exp %49 : vector<2x32xf32>
    %cst_18 = arith.constant 1.000000e+00 : f32
    %51 = vector.broadcast %cst_18 : f32 to vector<2x32xf32>
    %52 = arith.addf %51, %50 : vector<2x32xf32>
    %53 = arith.divf %51, %52 : vector<2x32xf32>
    %54 = vector.extract_strided_slice %37 {offsets = [0, 64], sizes = [2, 32], strides = [1, 1]} : vector<2x96xf32> to vector<2x32xf32>
    %55 = vector.extract_strided_slice %36 {offsets = [0, 64], sizes = [2, 32], strides = [1, 1]} : vector<2x96xf32> to vector<2x32xf32>
    %56 = arith.mulf %45, %55 : vector<2x32xf32>
    %57 = arith.addf %54, %56 : vector<2x32xf32>
    %58 = math.tanh %57 : vector<2x32xf32>
    %cst_19 = arith.constant 1.000000e+00 : f32
    %59 = vector.broadcast %cst_19 : f32 to vector<2x32xf32>
    %60 = arith.subf %59, %53 : vector<2x32xf32>
    %61 = arith.mulf %60, %58 : vector<2x32xf32>
    %62 = arith.mulf %53, %34 : vector<2x32xf32>
    %63 = arith.addf %61, %62 : vector<2x32xf32>
    %c2 = arith.constant 2 : index
    %c0_20 = arith.constant 0 : index
    %64 = vector.load %arg9[%c2, %c0_20] : memref<16x32xf32, #tpu.memory_space<vmem>>, vector<2x32xf32>
    tpu.vector_store %arg9[%c2, %c0_20], %63 {strides = array<i32>} : memref<16x32xf32, #tpu.memory_space<vmem>>, vector<2x32xf32>,
    %cst_21 = arith.constant dense<0.000000e+00> : vector<2x96xf32>
    %65 = tpu.matmul %63, %4, %cst_21 {dimension_numbers = #tpu.dot_dimension_numbers<[1], [0], [0], [1], [0, 0, 1, 1], [], []>} : vector<2x32xf32>, vector<32x96xf32>, vector<2x96xf32> -> vector<2x96xf32>
    %66 = vector.extract_strided_slice %5 {offsets = [4, 0], sizes = [2, 96], strides = [1, 1]} : vector<16x96xf32> to vector<2x96xf32>
    %67 = vector.extract_strided_slice %66 {offsets = [0, 0], sizes = [2, 32], strides = [1, 1]} : vector<2x96xf32> to vector<2x32xf32>
    %68 = vector.extract_strided_slice %65 {offsets = [0, 0], sizes = [2, 32], strides = [1, 1]} : vector<2x96xf32> to vector<2x32xf32>
    %69 = arith.addf %67, %68 : vector<2x32xf32>
    %70 = arith.negf %69 : vector<2x32xf32>
    %71 = math.exp %70 : vector<2x32xf32>
    %cst_22 = arith.constant 1.000000e+00 : f32
    %72 = vector.broadcast %cst_22 : f32 to vector<2x32xf32>
    %73 = arith.addf %72, %71 : vector<2x32xf32>
    %74 = arith.divf %72, %73 : vector<2x32xf32>
    %75 = vector.extract_strided_slice %66 {offsets = [0, 32], sizes = [2, 32], strides = [1, 1]} : vector<2x96xf32> to vector<2x32xf32>
    %76 = vector.extract_strided_slice %65 {offsets = [0, 32], sizes = [2, 32], strides = [1, 1]} : vector<2x96xf32> to vector<2x32xf32>
    %77 = arith.addf %75, %76 : vector<2x32xf32>
    %78 = arith.negf %77 : vector<2x32xf32>
    %79 = math.exp %78 : vector<2x32xf32>
    %cst_23 = arith.constant 1.000000e+00 : f32
    %80 = vector.broadcast %cst_23 : f32 to vector<2x32xf32>
    %81 = arith.addf %80, %79 : vector<2x32xf32>
    %82 = arith.divf %80, %81 : vector<2x32xf32>
    %83 = vector.extract_strided_slice %66 {offsets = [0, 64], sizes = [2, 32], strides = [1, 1]} : vector<2x96xf32> to vector<2x32xf32>
    %84 = vector.extract_strided_slice %65 {offsets = [0, 64], sizes = [2, 32], strides = [1, 1]} : vector<2x96xf32> to vector<2x32xf32>
    %85 = arith.mulf %74, %84 : vector<2x32xf32>
    %86 = arith.addf %83, %85 : vector<2x32xf32>
    %87 = math.tanh %86 : vector<2x32xf32>
    %cst_24 = arith.constant 1.000000e+00 : f32
    %88 = vector.broadcast %cst_24 : f32 to vector<2x32xf32>
    %89 = arith.subf %88, %82 : vector<2x32xf32>
    %90 = arith.mulf %89, %87 : vector<2x32xf32>
    %91 = arith.mulf %82, %63 : vector<2x32xf32>
    %92 = arith.addf %90, %91 : vector<2x32xf32>
    %c4 = arith.constant 4 : index
    %c0_25 = arith.constant 0 : index
    %93 = vector.load %arg9[%c4, %c0_25] : memref<16x32xf32, #tpu.memory_space<vmem>>, vector<2x32xf32>
    tpu.vector_store %arg9[%c4, %c0_25], %92 {strides = array<i32>} : memref<16x32xf32, #tpu.memory_space<vmem>>, vector<2x32xf32>,
    %cst_26 = arith.constant dense<0.000000e+00> : vector<2x96xf32>
    %94 = tpu.matmul %92, %4, %cst_26 {dimension_numbers = #tpu.dot_dimension_numbers<[1], [0], [0], [1], [0, 0, 1, 1], [], []>} : vector<2x32xf32>, vector<32x96xf32>, vector<2x96xf32> -> vector<2x96xf32>
    %95 = vector.extract_strided_slice %5 {offsets = [6, 0], sizes = [2, 96], strides = [1, 1]} : vector<16x96xf32> to vector<2x96xf32>
    %96 = vector.extract_strided_slice %95 {offsets = [0, 0], sizes = [2, 32], strides = [1, 1]} : vector<2x96xf32> to vector<2x32xf32>
    %97 = vector.extract_strided_slice %94 {offsets = [0, 0], sizes = [2, 32], strides = [1, 1]} : vector<2x96xf32> to vector<2x32xf32>
    %98 = arith.addf %96, %97 : vector<2x32xf32>
    %99 = arith.negf %98 : vector<2x32xf32>
    %100 = math.exp %99 : vector<2x32xf32>
    %cst_27 = arith.constant 1.000000e+00 : f32
    %101 = vector.broadcast %cst_27 : f32 to vector<2x32xf32>
    %102 = arith.addf %101, %100 : vector<2x32xf32>
    %103 = arith.divf %101, %102 : vector<2x32xf32>
    %104 = vector.extract_strided_slice %95 {offsets = [0, 32], sizes = [2, 32], strides = [1, 1]} : vector<2x96xf32> to vector<2x32xf32>
    %105 = vector.extract_strided_slice %94 {offsets = [0, 32], sizes = [2, 32], strides = [1, 1]} : vector<2x96xf32> to vector<2x32xf32>
    %106 = arith.addf %104, %105 : vector<2x32xf32>
    %107 = arith.negf %106 : vector<2x32xf32>
    %108 = math.exp %107 : vector<2x32xf32>
    %cst_28 = arith.constant 1.000000e+00 : f32
    %109 = vector.broadcast %cst_28 : f32 to vector<2x32xf32>
    %110 = arith.addf %109, %108 : vector<2x32xf32>
    %111 = arith.divf %109, %110 : vector<2x32xf32>
    %112 = vector.extract_strided_slice %95 {offsets = [0, 64], sizes = [2, 32], strides = [1, 1]} : vector<2x96xf32> to vector<2x32xf32>
    %113 = vector.extract_strided_slice %94 {offsets = [0, 64], sizes = [2, 32], strides = [1, 1]} : vector<2x96xf32> to vector<2x32xf32>
    %114 = arith.mulf %103, %113 : vector<2x32xf32>
    %115 = arith.addf %112, %114 : vector<2x32xf32>
    %116 = math.tanh %115 : vector<2x32xf32>
    %cst_29 = arith.constant 1.000000e+00 : f32
    %117 = vector.broadcast %cst_29 : f32 to vector<2x32xf32>
    %118 = arith.subf %117, %111 : vector<2x32xf32>
    %119 = arith.mulf %118, %116 : vector<2x32xf32>
    %120 = arith.mulf %111, %92 : vector<2x32xf32>
    %121 = arith.addf %119, %120 : vector<2x32xf32>
    %c6 = arith.constant 6 : index
    %c0_30 = arith.constant 0 : index
    %122 = vector.load %arg9[%c6, %c0_30] : memref<16x32xf32, #tpu.memory_space<vmem>>, vector<2x32xf32>
    tpu.vector_store %arg9[%c6, %c0_30], %121 {strides = array<i32>} : memref<16x32xf32, #tpu.memory_space<vmem>>, vector<2x32xf32>,
    %cst_31 = arith.constant dense<0.000000e+00> : vector<2x96xf32>
    %123 = tpu.matmul %121, %4, %cst_31 {dimension_numbers = #tpu.dot_dimension_numbers<[1], [0], [0], [1], [0, 0, 1, 1], [], []>} : vector<2x32xf32>, vector<32x96xf32>, vector<2x96xf32> -> vector<2x96xf32>
    %124 = vector.extract_strided_slice %5 {offsets = [8, 0], sizes = [2, 96], strides = [1, 1]} : vector<16x96xf32> to vector<2x96xf32>
    %125 = vector.extract_strided_slice %124 {offsets = [0, 0], sizes = [2, 32], strides = [1, 1]} : vector<2x96xf32> to vector<2x32xf32>
    %126 = vector.extract_strided_slice %123 {offsets = [0, 0], sizes = [2, 32], strides = [1, 1]} : vector<2x96xf32> to vector<2x32xf32>
    %127 = arith.addf %125, %126 : vector<2x32xf32>
    %128 = arith.negf %127 : vector<2x32xf32>
    %129 = math.exp %128 : vector<2x32xf32>
    %cst_32 = arith.constant 1.000000e+00 : f32
    %130 = vector.broadcast %cst_32 : f32 to vector<2x32xf32>
    %131 = arith.addf %130, %129 : vector<2x32xf32>
    %132 = arith.divf %130, %131 : vector<2x32xf32>
    %133 = vector.extract_strided_slice %124 {offsets = [0, 32], sizes = [2, 32], strides = [1, 1]} : vector<2x96xf32> to vector<2x32xf32>
    %134 = vector.extract_strided_slice %123 {offsets = [0, 32], sizes = [2, 32], strides = [1, 1]} : vector<2x96xf32> to vector<2x32xf32>
    %135 = arith.addf %133, %134 : vector<2x32xf32>
    %136 = arith.negf %135 : vector<2x32xf32>
    %137 = math.exp %136 : vector<2x32xf32>
    %cst_33 = arith.constant 1.000000e+00 : f32
    %138 = vector.broadcast %cst_33 : f32 to vector<2x32xf32>
    %139 = arith.addf %138, %137 : vector<2x32xf32>
    %140 = arith.divf %138, %139 : vector<2x32xf32>
    %141 = vector.extract_strided_slice %124 {offsets = [0, 64], sizes = [2, 32], strides = [1, 1]} : vector<2x96xf32> to vector<2x32xf32>
    %142 = vector.extract_strided_slice %123 {offsets = [0, 64], sizes = [2, 32], strides = [1, 1]} : vector<2x96xf32> to vector<2x32xf32>
    %143 = arith.mulf %132, %142 : vector<2x32xf32>
    %144 = arith.addf %141, %143 : vector<2x32xf32>
    %145 = math.tanh %144 : vector<2x32xf32>
    %cst_34 = arith.constant 1.000000e+00 : f32
    %146 = vector.broadcast %cst_34 : f32 to vector<2x32xf32>
    %147 = arith.subf %146, %140 : vector<2x32xf32>
    %148 = arith.mulf %147, %145 : vector<2x32xf32>
    %149 = arith.mulf %140, %121 : vector<2x32xf32>
    %150 = arith.addf %148, %149 : vector<2x32xf32>
    %c8 = arith.constant 8 : index
    %c0_35 = arith.constant 0 : index
    %151 = vector.load %arg9[%c8, %c0_35] : memref<16x32xf32, #tpu.memory_space<vmem>>, vector<2x32xf32>
    tpu.vector_store %arg9[%c8, %c0_35], %150 {strides = array<i32>} : memref<16x32xf32, #tpu.memory_space<vmem>>, vector<2x32xf32>,
    %cst_36 = arith.constant dense<0.000000e+00> : vector<2x96xf32>
    %152 = tpu.matmul %150, %4, %cst_36 {dimension_numbers = #tpu.dot_dimension_numbers<[1], [0], [0], [1], [0, 0, 1, 1], [], []>} : vector<2x32xf32>, vector<32x96xf32>, vector<2x96xf32> -> vector<2x96xf32>
    %153 = vector.extract_strided_slice %5 {offsets = [10, 0], sizes = [2, 96], strides = [1, 1]} : vector<16x96xf32> to vector<2x96xf32>
    %154 = vector.extract_strided_slice %153 {offsets = [0, 0], sizes = [2, 32], strides = [1, 1]} : vector<2x96xf32> to vector<2x32xf32>
    %155 = vector.extract_strided_slice %152 {offsets = [0, 0], sizes = [2, 32], strides = [1, 1]} : vector<2x96xf32> to vector<2x32xf32>
    %156 = arith.addf %154, %155 : vector<2x32xf32>
    %157 = arith.negf %156 : vector<2x32xf32>
    %158 = math.exp %157 : vector<2x32xf32>
    %cst_37 = arith.constant 1.000000e+00 : f32
    %159 = vector.broadcast %cst_37 : f32 to vector<2x32xf32>
    %160 = arith.addf %159, %158 : vector<2x32xf32>
    %161 = arith.divf %159, %160 : vector<2x32xf32>
    %162 = vector.extract_strided_slice %153 {offsets = [0, 32], sizes = [2, 32], strides = [1, 1]} : vector<2x96xf32> to vector<2x32xf32>
    %163 = vector.extract_strided_slice %152 {offsets = [0, 32], sizes = [2, 32], strides = [1, 1]} : vector<2x96xf32> to vector<2x32xf32>
    %164 = arith.addf %162, %163 : vector<2x32xf32>
    %165 = arith.negf %164 : vector<2x32xf32>
    %166 = math.exp %165 : vector<2x32xf32>
    %cst_38 = arith.constant 1.000000e+00 : f32
    %167 = vector.broadcast %cst_38 : f32 to vector<2x32xf32>
    %168 = arith.addf %167, %166 : vector<2x32xf32>
    %169 = arith.divf %167, %168 : vector<2x32xf32>
    %170 = vector.extract_strided_slice %153 {offsets = [0, 64], sizes = [2, 32], strides = [1, 1]} : vector<2x96xf32> to vector<2x32xf32>
    %171 = vector.extract_strided_slice %152 {offsets = [0, 64], sizes = [2, 32], strides = [1, 1]} : vector<2x96xf32> to vector<2x32xf32>
    %172 = arith.mulf %161, %171 : vector<2x32xf32>
    %173 = arith.addf %170, %172 : vector<2x32xf32>
    %174 = math.tanh %173 : vector<2x32xf32>
    %cst_39 = arith.constant 1.000000e+00 : f32
    %175 = vector.broadcast %cst_39 : f32 to vector<2x32xf32>
    %176 = arith.subf %175, %169 : vector<2x32xf32>
    %177 = arith.mulf %176, %174 : vector<2x32xf32>
    %178 = arith.mulf %169, %150 : vector<2x32xf32>
    %179 = arith.addf %177, %178 : vector<2x32xf32>
    %c10 = arith.constant 10 : index
    %c0_40 = arith.constant 0 : index
    %180 = vector.load %arg9[%c10, %c0_40] : memref<16x32xf32, #tpu.memory_space<vmem>>, vector<2x32xf32>
    tpu.vector_store %arg9[%c10, %c0_40], %179 {strides = array<i32>} : memref<16x32xf32, #tpu.memory_space<vmem>>, vector<2x32xf32>,
    %cst_41 = arith.constant dense<0.000000e+00> : vector<2x96xf32>
    %181 = tpu.matmul %179, %4, %cst_41 {dimension_numbers = #tpu.dot_dimension_numbers<[1], [0], [0], [1], [0, 0, 1, 1], [], []>} : vector<2x32xf32>, vector<32x96xf32>, vector<2x96xf32> -> vector<2x96xf32>
    %182 = vector.extract_strided_slice %5 {offsets = [12, 0], sizes = [2, 96], strides = [1, 1]} : vector<16x96xf32> to vector<2x96xf32>
    %183 = vector.extract_strided_slice %182 {offsets = [0, 0], sizes = [2, 32], strides = [1, 1]} : vector<2x96xf32> to vector<2x32xf32>
    %184 = vector.extract_strided_slice %181 {offsets = [0, 0], sizes = [2, 32], strides = [1, 1]} : vector<2x96xf32> to vector<2x32xf32>
    %185 = arith.addf %183, %184 : vector<2x32xf32>
    %186 = arith.negf %185 : vector<2x32xf32>
    %187 = math.exp %186 : vector<2x32xf32>
    %cst_42 = arith.constant 1.000000e+00 : f32
    %188 = vector.broadcast %cst_42 : f32 to vector<2x32xf32>
    %189 = arith.addf %188, %187 : vector<2x32xf32>
    %190 = arith.divf %188, %189 : vector<2x32xf32>
    %191 = vector.extract_strided_slice %182 {offsets = [0, 32], sizes = [2, 32], strides = [1, 1]} : vector<2x96xf32> to vector<2x32xf32>
    %192 = vector.extract_strided_slice %181 {offsets = [0, 32], sizes = [2, 32], strides = [1, 1]} : vector<2x96xf32> to vector<2x32xf32>
    %193 = arith.addf %191, %192 : vector<2x32xf32>
    %194 = arith.negf %193 : vector<2x32xf32>
    %195 = math.exp %194 : vector<2x32xf32>
    %cst_43 = arith.constant 1.000000e+00 : f32
    %196 = vector.broadcast %cst_43 : f32 to vector<2x32xf32>
    %197 = arith.addf %196, %195 : vector<2x32xf32>
    %198 = arith.divf %196, %197 : vector<2x32xf32>
    %199 = vector.extract_strided_slice %182 {offsets = [0, 64], sizes = [2, 32], strides = [1, 1]} : vector<2x96xf32> to vector<2x32xf32>
    %200 = vector.extract_strided_slice %181 {offsets = [0, 64], sizes = [2, 32], strides = [1, 1]} : vector<2x96xf32> to vector<2x32xf32>
    %201 = arith.mulf %190, %200 : vector<2x32xf32>
    %202 = arith.addf %199, %201 : vector<2x32xf32>
    %203 = math.tanh %202 : vector<2x32xf32>
    %cst_44 = arith.constant 1.000000e+00 : f32
    %204 = vector.broadcast %cst_44 : f32 to vector<2x32xf32>
    %205 = arith.subf %204, %198 : vector<2x32xf32>
    %206 = arith.mulf %205, %203 : vector<2x32xf32>
    %207 = arith.mulf %198, %179 : vector<2x32xf32>
    %208 = arith.addf %206, %207 : vector<2x32xf32>
    %c12 = arith.constant 12 : index
    %c0_45 = arith.constant 0 : index
    %209 = vector.load %arg9[%c12, %c0_45] : memref<16x32xf32, #tpu.memory_space<vmem>>, vector<2x32xf32>
    tpu.vector_store %arg9[%c12, %c0_45], %208 {strides = array<i32>} : memref<16x32xf32, #tpu.memory_space<vmem>>, vector<2x32xf32>,
    %cst_46 = arith.constant dense<0.000000e+00> : vector<2x96xf32>
    %210 = tpu.matmul %208, %4, %cst_46 {dimension_numbers = #tpu.dot_dimension_numbers<[1], [0], [0], [1], [0, 0, 1, 1], [], []>} : vector<2x32xf32>, vector<32x96xf32>, vector<2x96xf32> -> vector<2x96xf32>
    %211 = vector.extract_strided_slice %5 {offsets = [14, 0], sizes = [2, 96], strides = [1, 1]} : vector<16x96xf32> to vector<2x96xf32>
    %212 = vector.extract_strided_slice %211 {offsets = [0, 0], sizes = [2, 32], strides = [1, 1]} : vector<2x96xf32> to vector<2x32xf32>
    %213 = vector.extract_strided_slice %210 {offsets = [0, 0], sizes = [2, 32], strides = [1, 1]} : vector<2x96xf32> to vector<2x32xf32>
    %214 = arith.addf %212, %213 : vector<2x32xf32>
    %215 = arith.negf %214 : vector<2x32xf32>
    %216 = math.exp %215 : vector<2x32xf32>
    %cst_47 = arith.constant 1.000000e+00 : f32
    %217 = vector.broadcast %cst_47 : f32 to vector<2x32xf32>
    %218 = arith.addf %217, %216 : vector<2x32xf32>
    %219 = arith.divf %217, %218 : vector<2x32xf32>
    %220 = vector.extract_strided_slice %211 {offsets = [0, 32], sizes = [2, 32], strides = [1, 1]} : vector<2x96xf32> to vector<2x32xf32>
    %221 = vector.extract_strided_slice %210 {offsets = [0, 32], sizes = [2, 32], strides = [1, 1]} : vector<2x96xf32> to vector<2x32xf32>
    %222 = arith.addf %220, %221 : vector<2x32xf32>
    %223 = arith.negf %222 : vector<2x32xf32>
    %224 = math.exp %223 : vector<2x32xf32>
    %cst_48 = arith.constant 1.000000e+00 : f32
    %225 = vector.broadcast %cst_48 : f32 to vector<2x32xf32>
    %226 = arith.addf %225, %224 : vector<2x32xf32>
    %227 = arith.divf %225, %226 : vector<2x32xf32>
    %228 = vector.extract_strided_slice %211 {offsets = [0, 64], sizes = [2, 32], strides = [1, 1]} : vector<2x96xf32> to vector<2x32xf32>
    %229 = vector.extract_strided_slice %210 {offsets = [0, 64], sizes = [2, 32], strides = [1, 1]} : vector<2x96xf32> to vector<2x32xf32>
    %230 = arith.mulf %219, %229 : vector<2x32xf32>
    %231 = arith.addf %228, %230 : vector<2x32xf32>
    %232 = math.tanh %231 : vector<2x32xf32>
    %cst_49 = arith.constant 1.000000e+00 : f32
    %233 = vector.broadcast %cst_49 : f32 to vector<2x32xf32>
    %234 = arith.subf %233, %227 : vector<2x32xf32>
    %235 = arith.mulf %234, %232 : vector<2x32xf32>
    %236 = arith.mulf %227, %208 : vector<2x32xf32>
    %237 = arith.addf %235, %236 : vector<2x32xf32>
    %c14 = arith.constant 14 : index
    %c0_50 = arith.constant 0 : index
    %238 = vector.load %arg9[%c14, %c0_50] : memref<16x32xf32, #tpu.memory_space<vmem>>, vector<2x32xf32>
    tpu.vector_store %arg9[%c14, %c0_50], %237 {strides = array<i32>} : memref<16x32xf32, #tpu.memory_space<vmem>>, vector<2x32xf32>,
    %c0_51 = arith.constant 0 : index
    %c0_52 = arith.constant 0 : index
    %239 = vector.load %arg9[%c0_51, %c0_52] : memref<16x32xf32, #tpu.memory_space<vmem>>, vector<16x32xf32>
    %c0_53 = arith.constant 0 : index
    %c0_54 = arith.constant 0 : index
    %240 = vector.load %arg4[%c0_53, %c0_54] : memref<32x96xf32, #tpu.memory_space<vmem>>, vector<32x96xf32>
    %c0_55 = arith.constant 0 : index
    %c0_56 = arith.constant 0 : index
    %241 = vector.load %arg5[%c0_55, %c0_56] : memref<32x96xf32, #tpu.memory_space<vmem>>, vector<32x96xf32>
    %cst_57 = arith.constant dense<0.000000e+00> : vector<16x96xf32>
    %242 = tpu.matmul %239, %240, %cst_57 {dimension_numbers = #tpu.dot_dimension_numbers<[1], [0], [0], [1], [0, 0, 1, 1], [], []>} : vector<16x32xf32>, vector<32x96xf32>, vector<16x96xf32> -> vector<16x96xf32>
    %cst_58 = arith.constant 0.000000e+00 : f32
    %243 = vector.broadcast %cst_58 : f32 to vector<2x32xf32>
    %cst_59 = arith.constant dense<0.000000e+00> : vector<2x96xf32>
    %244 = tpu.matmul %243, %241, %cst_59 {dimension_numbers = #tpu.dot_dimension_numbers<[1], [0], [0], [1], [0, 0, 1, 1], [], []>} : vector<2x32xf32>, vector<32x96xf32>, vector<2x96xf32> -> vector<2x96xf32>
    %245 = vector.extract_strided_slice %242 {offsets = [0, 0], sizes = [2, 96], strides = [1, 1]} : vector<16x96xf32> to vector<2x96xf32>
    %246 = vector.extract_strided_slice %245 {offsets = [0, 0], sizes = [2, 32], strides = [1, 1]} : vector<2x96xf32> to vector<2x32xf32>
    %247 = vector.extract_strided_slice %244 {offsets = [0, 0], sizes = [2, 32], strides = [1, 1]} : vector<2x96xf32> to vector<2x32xf32>
    %248 = arith.addf %246, %247 : vector<2x32xf32>
    %249 = arith.negf %248 : vector<2x32xf32>
    %250 = math.exp %249 : vector<2x32xf32>
    %cst_60 = arith.constant 1.000000e+00 : f32
    %251 = vector.broadcast %cst_60 : f32 to vector<2x32xf32>
    %252 = arith.addf %251, %250 : vector<2x32xf32>
    %253 = arith.divf %251, %252 : vector<2x32xf32>
    %254 = vector.extract_strided_slice %245 {offsets = [0, 32], sizes = [2, 32], strides = [1, 1]} : vector<2x96xf32> to vector<2x32xf32>
    %255 = vector.extract_strided_slice %244 {offsets = [0, 32], sizes = [2, 32], strides = [1, 1]} : vector<2x96xf32> to vector<2x32xf32>
    %256 = arith.addf %254, %255 : vector<2x32xf32>
    %257 = arith.negf %256 : vector<2x32xf32>
    %258 = math.exp %257 : vector<2x32xf32>
    %cst_61 = arith.constant 1.000000e+00 : f32
    %259 = vector.broadcast %cst_61 : f32 to vector<2x32xf32>
    %260 = arith.addf %259, %258 : vector<2x32xf32>
    %261 = arith.divf %259, %260 : vector<2x32xf32>
    %262 = vector.extract_strided_slice %245 {offsets = [0, 64], sizes = [2, 32], strides = [1, 1]} : vector<2x96xf32> to vector<2x32xf32>
    %263 = vector.extract_strided_slice %244 {offsets = [0, 64], sizes = [2, 32], strides = [1, 1]} : vector<2x96xf32> to vector<2x32xf32>
    %264 = arith.mulf %253, %263 : vector<2x32xf32>
    %265 = arith.addf %262, %264 : vector<2x32xf32>
    %266 = math.tanh %265 : vector<2x32xf32>
    %cst_62 = arith.constant 1.000000e+00 : f32
    %267 = vector.broadcast %cst_62 : f32 to vector<2x32xf32>
    %268 = arith.subf %267, %261 : vector<2x32xf32>
    %269 = arith.mulf %268, %266 : vector<2x32xf32>
    %270 = arith.mulf %261, %243 : vector<2x32xf32>
    %271 = arith.addf %269, %270 : vector<2x32xf32>
    %c0_63 = arith.constant 0 : index
    %c0_64 = arith.constant 0 : index
    %272 = vector.load %arg9[%c0_63, %c0_64] : memref<16x32xf32, #tpu.memory_space<vmem>>, vector<2x32xf32>
    tpu.vector_store %arg9[%c0_63, %c0_64], %271 {strides = array<i32>} : memref<16x32xf32, #tpu.memory_space<vmem>>, vector<2x32xf32>,
    %cst_65 = arith.constant dense<0.000000e+00> : vector<2x96xf32>
    %273 = tpu.matmul %271, %241, %cst_65 {dimension_numbers = #tpu.dot_dimension_numbers<[1], [0], [0], [1], [0, 0, 1, 1], [], []>} : vector<2x32xf32>, vector<32x96xf32>, vector<2x96xf32> -> vector<2x96xf32>
    %274 = vector.extract_strided_slice %242 {offsets = [2, 0], sizes = [2, 96], strides = [1, 1]} : vector<16x96xf32> to vector<2x96xf32>
    %275 = vector.extract_strided_slice %274 {offsets = [0, 0], sizes = [2, 32], strides = [1, 1]} : vector<2x96xf32> to vector<2x32xf32>
    %276 = vector.extract_strided_slice %273 {offsets = [0, 0], sizes = [2, 32], strides = [1, 1]} : vector<2x96xf32> to vector<2x32xf32>
    %277 = arith.addf %275, %276 : vector<2x32xf32>
    %278 = arith.negf %277 : vector<2x32xf32>
    %279 = math.exp %278 : vector<2x32xf32>
    %cst_66 = arith.constant 1.000000e+00 : f32
    %280 = vector.broadcast %cst_66 : f32 to vector<2x32xf32>
    %281 = arith.addf %280, %279 : vector<2x32xf32>
    %282 = arith.divf %280, %281 : vector<2x32xf32>
    %283 = vector.extract_strided_slice %274 {offsets = [0, 32], sizes = [2, 32], strides = [1, 1]} : vector<2x96xf32> to vector<2x32xf32>
    %284 = vector.extract_strided_slice %273 {offsets = [0, 32], sizes = [2, 32], strides = [1, 1]} : vector<2x96xf32> to vector<2x32xf32>
    %285 = arith.addf %283, %284 : vector<2x32xf32>
    %286 = arith.negf %285 : vector<2x32xf32>
    %287 = math.exp %286 : vector<2x32xf32>
    %cst_67 = arith.constant 1.000000e+00 : f32
    %288 = vector.broadcast %cst_67 : f32 to vector<2x32xf32>
    %289 = arith.addf %288, %287 : vector<2x32xf32>
    %290 = arith.divf %288, %289 : vector<2x32xf32>
    %291 = vector.extract_strided_slice %274 {offsets = [0, 64], sizes = [2, 32], strides = [1, 1]} : vector<2x96xf32> to vector<2x32xf32>
    %292 = vector.extract_strided_slice %273 {offsets = [0, 64], sizes = [2, 32], strides = [1, 1]} : vector<2x96xf32> to vector<2x32xf32>
    %293 = arith.mulf %282, %292 : vector<2x32xf32>
    %294 = arith.addf %291, %293 : vector<2x32xf32>
    %295 = math.tanh %294 : vector<2x32xf32>
    %cst_68 = arith.constant 1.000000e+00 : f32
    %296 = vector.broadcast %cst_68 : f32 to vector<2x32xf32>
    %297 = arith.subf %296, %290 : vector<2x32xf32>
    %298 = arith.mulf %297, %295 : vector<2x32xf32>
    %299 = arith.mulf %290, %271 : vector<2x32xf32>
    %300 = arith.addf %298, %299 : vector<2x32xf32>
    %c2_69 = arith.constant 2 : index
    %c0_70 = arith.constant 0 : index
    %301 = vector.load %arg9[%c2_69, %c0_70] : memref<16x32xf32, #tpu.memory_space<vmem>>, vector<2x32xf32>
    tpu.vector_store %arg9[%c2_69, %c0_70], %300 {strides = array<i32>} : memref<16x32xf32, #tpu.memory_space<vmem>>, vector<2x32xf32>,
    %cst_71 = arith.constant dense<0.000000e+00> : vector<2x96xf32>
    %302 = tpu.matmul %300, %241, %cst_71 {dimension_numbers = #tpu.dot_dimension_numbers<[1], [0], [0], [1], [0, 0, 1, 1], [], []>} : vector<2x32xf32>, vector<32x96xf32>, vector<2x96xf32> -> vector<2x96xf32>
    %303 = vector.extract_strided_slice %242 {offsets = [4, 0], sizes = [2, 96], strides = [1, 1]} : vector<16x96xf32> to vector<2x96xf32>
    %304 = vector.extract_strided_slice %303 {offsets = [0, 0], sizes = [2, 32], strides = [1, 1]} : vector<2x96xf32> to vector<2x32xf32>
    %305 = vector.extract_strided_slice %302 {offsets = [0, 0], sizes = [2, 32], strides = [1, 1]} : vector<2x96xf32> to vector<2x32xf32>
    %306 = arith.addf %304, %305 : vector<2x32xf32>
    %307 = arith.negf %306 : vector<2x32xf32>
    %308 = math.exp %307 : vector<2x32xf32>
    %cst_72 = arith.constant 1.000000e+00 : f32
    %309 = vector.broadcast %cst_72 : f32 to vector<2x32xf32>
    %310 = arith.addf %309, %308 : vector<2x32xf32>
    %311 = arith.divf %309, %310 : vector<2x32xf32>
    %312 = vector.extract_strided_slice %303 {offsets = [0, 32], sizes = [2, 32], strides = [1, 1]} : vector<2x96xf32> to vector<2x32xf32>
    %313 = vector.extract_strided_slice %302 {offsets = [0, 32], sizes = [2, 32], strides = [1, 1]} : vector<2x96xf32> to vector<2x32xf32>
    %314 = arith.addf %312, %313 : vector<2x32xf32>
    %315 = arith.negf %314 : vector<2x32xf32>
    %316 = math.exp %315 : vector<2x32xf32>
    %cst_73 = arith.constant 1.000000e+00 : f32
    %317 = vector.broadcast %cst_73 : f32 to vector<2x32xf32>
    %318 = arith.addf %317, %316 : vector<2x32xf32>
    %319 = arith.divf %317, %318 : vector<2x32xf32>
    %320 = vector.extract_strided_slice %303 {offsets = [0, 64], sizes = [2, 32], strides = [1, 1]} : vector<2x96xf32> to vector<2x32xf32>
    %321 = vector.extract_strided_slice %302 {offsets = [0, 64], sizes = [2, 32], strides = [1, 1]} : vector<2x96xf32> to vector<2x32xf32>
    %322 = arith.mulf %311, %321 : vector<2x32xf32>
    %323 = arith.addf %320, %322 : vector<2x32xf32>
    %324 = math.tanh %323 : vector<2x32xf32>
    %cst_74 = arith.constant 1.000000e+00 : f32
    %325 = vector.broadcast %cst_74 : f32 to vector<2x32xf32>
    %326 = arith.subf %325, %319 : vector<2x32xf32>
    %327 = arith.mulf %326, %324 : vector<2x32xf32>
    %328 = arith.mulf %319, %300 : vector<2x32xf32>
    %329 = arith.addf %327, %328 : vector<2x32xf32>
    %c4_75 = arith.constant 4 : index
    %c0_76 = arith.constant 0 : index
    %330 = vector.load %arg9[%c4_75, %c0_76] : memref<16x32xf32, #tpu.memory_space<vmem>>, vector<2x32xf32>
    tpu.vector_store %arg9[%c4_75, %c0_76], %329 {strides = array<i32>} : memref<16x32xf32, #tpu.memory_space<vmem>>, vector<2x32xf32>,
    %cst_77 = arith.constant dense<0.000000e+00> : vector<2x96xf32>
    %331 = tpu.matmul %329, %241, %cst_77 {dimension_numbers = #tpu.dot_dimension_numbers<[1], [0], [0], [1], [0, 0, 1, 1], [], []>} : vector<2x32xf32>, vector<32x96xf32>, vector<2x96xf32> -> vector<2x96xf32>
    %332 = vector.extract_strided_slice %242 {offsets = [6, 0], sizes = [2, 96], strides = [1, 1]} : vector<16x96xf32> to vector<2x96xf32>
    %333 = vector.extract_strided_slice %332 {offsets = [0, 0], sizes = [2, 32], strides = [1, 1]} : vector<2x96xf32> to vector<2x32xf32>
    %334 = vector.extract_strided_slice %331 {offsets = [0, 0], sizes = [2, 32], strides = [1, 1]} : vector<2x96xf32> to vector<2x32xf32>
    %335 = arith.addf %333, %334 : vector<2x32xf32>
    %336 = arith.negf %335 : vector<2x32xf32>
    %337 = math.exp %336 : vector<2x32xf32>
    %cst_78 = arith.constant 1.000000e+00 : f32
    %338 = vector.broadcast %cst_78 : f32 to vector<2x32xf32>
    %339 = arith.addf %338, %337 : vector<2x32xf32>
    %340 = arith.divf %338, %339 : vector<2x32xf32>
    %341 = vector.extract_strided_slice %332 {offsets = [0, 32], sizes = [2, 32], strides = [1, 1]} : vector<2x96xf32> to vector<2x32xf32>
    %342 = vector.extract_strided_slice %331 {offsets = [0, 32], sizes = [2, 32], strides = [1, 1]} : vector<2x96xf32> to vector<2x32xf32>
    %343 = arith.addf %341, %342 : vector<2x32xf32>
    %344 = arith.negf %343 : vector<2x32xf32>
    %345 = math.exp %344 : vector<2x32xf32>
    %cst_79 = arith.constant 1.000000e+00 : f32
    %346 = vector.broadcast %cst_79 : f32 to vector<2x32xf32>
    %347 = arith.addf %346, %345 : vector<2x32xf32>
    %348 = arith.divf %346, %347 : vector<2x32xf32>
    %349 = vector.extract_strided_slice %332 {offsets = [0, 64], sizes = [2, 32], strides = [1, 1]} : vector<2x96xf32> to vector<2x32xf32>
    %350 = vector.extract_strided_slice %331 {offsets = [0, 64], sizes = [2, 32], strides = [1, 1]} : vector<2x96xf32> to vector<2x32xf32>
    %351 = arith.mulf %340, %350 : vector<2x32xf32>
    %352 = arith.addf %349, %351 : vector<2x32xf32>
    %353 = math.tanh %352 : vector<2x32xf32>
    %cst_80 = arith.constant 1.000000e+00 : f32
    %354 = vector.broadcast %cst_80 : f32 to vector<2x32xf32>
    %355 = arith.subf %354, %348 : vector<2x32xf32>
    %356 = arith.mulf %355, %353 : vector<2x32xf32>
    %357 = arith.mulf %348, %329 : vector<2x32xf32>
    %358 = arith.addf %356, %357 : vector<2x32xf32>
    %c6_81 = arith.constant 6 : index
    %c0_82 = arith.constant 0 : index
    %359 = vector.load %arg9[%c6_81, %c0_82] : memref<16x32xf32, #tpu.memory_space<vmem>>, vector<2x32xf32>
    tpu.vector_store %arg9[%c6_81, %c0_82], %358 {strides = array<i32>} : memref<16x32xf32, #tpu.memory_space<vmem>>, vector<2x32xf32>,
    %cst_83 = arith.constant dense<0.000000e+00> : vector<2x96xf32>
    %360 = tpu.matmul %358, %241, %cst_83 {dimension_numbers = #tpu.dot_dimension_numbers<[1], [0], [0], [1], [0, 0, 1, 1], [], []>} : vector<2x32xf32>, vector<32x96xf32>, vector<2x96xf32> -> vector<2x96xf32>
    %361 = vector.extract_strided_slice %242 {offsets = [8, 0], sizes = [2, 96], strides = [1, 1]} : vector<16x96xf32> to vector<2x96xf32>
    %362 = vector.extract_strided_slice %361 {offsets = [0, 0], sizes = [2, 32], strides = [1, 1]} : vector<2x96xf32> to vector<2x32xf32>
    %363 = vector.extract_strided_slice %360 {offsets = [0, 0], sizes = [2, 32], strides = [1, 1]} : vector<2x96xf32> to vector<2x32xf32>
    %364 = arith.addf %362, %363 : vector<2x32xf32>
    %365 = arith.negf %364 : vector<2x32xf32>
    %366 = math.exp %365 : vector<2x32xf32>
    %cst_84 = arith.constant 1.000000e+00 : f32
    %367 = vector.broadcast %cst_84 : f32 to vector<2x32xf32>
    %368 = arith.addf %367, %366 : vector<2x32xf32>
    %369 = arith.divf %367, %368 : vector<2x32xf32>
    %370 = vector.extract_strided_slice %361 {offsets = [0, 32], sizes = [2, 32], strides = [1, 1]} : vector<2x96xf32> to vector<2x32xf32>
    %371 = vector.extract_strided_slice %360 {offsets = [0, 32], sizes = [2, 32], strides = [1, 1]} : vector<2x96xf32> to vector<2x32xf32>
    %372 = arith.addf %370, %371 : vector<2x32xf32>
    %373 = arith.negf %372 : vector<2x32xf32>
    %374 = math.exp %373 : vector<2x32xf32>
    %cst_85 = arith.constant 1.000000e+00 : f32
    %375 = vector.broadcast %cst_85 : f32 to vector<2x32xf32>
    %376 = arith.addf %375, %374 : vector<2x32xf32>
    %377 = arith.divf %375, %376 : vector<2x32xf32>
    %378 = vector.extract_strided_slice %361 {offsets = [0, 64], sizes = [2, 32], strides = [1, 1]} : vector<2x96xf32> to vector<2x32xf32>
    %379 = vector.extract_strided_slice %360 {offsets = [0, 64], sizes = [2, 32], strides = [1, 1]} : vector<2x96xf32> to vector<2x32xf32>
    %380 = arith.mulf %369, %379 : vector<2x32xf32>
    %381 = arith.addf %378, %380 : vector<2x32xf32>
    %382 = math.tanh %381 : vector<2x32xf32>
    %cst_86 = arith.constant 1.000000e+00 : f32
    %383 = vector.broadcast %cst_86 : f32 to vector<2x32xf32>
    %384 = arith.subf %383, %377 : vector<2x32xf32>
    %385 = arith.mulf %384, %382 : vector<2x32xf32>
    %386 = arith.mulf %377, %358 : vector<2x32xf32>
    %387 = arith.addf %385, %386 : vector<2x32xf32>
    %c8_87 = arith.constant 8 : index
    %c0_88 = arith.constant 0 : index
    %388 = vector.load %arg9[%c8_87, %c0_88] : memref<16x32xf32, #tpu.memory_space<vmem>>, vector<2x32xf32>
    tpu.vector_store %arg9[%c8_87, %c0_88], %387 {strides = array<i32>} : memref<16x32xf32, #tpu.memory_space<vmem>>, vector<2x32xf32>,
    %cst_89 = arith.constant dense<0.000000e+00> : vector<2x96xf32>
    %389 = tpu.matmul %387, %241, %cst_89 {dimension_numbers = #tpu.dot_dimension_numbers<[1], [0], [0], [1], [0, 0, 1, 1], [], []>} : vector<2x32xf32>, vector<32x96xf32>, vector<2x96xf32> -> vector<2x96xf32>
    %390 = vector.extract_strided_slice %242 {offsets = [10, 0], sizes = [2, 96], strides = [1, 1]} : vector<16x96xf32> to vector<2x96xf32>
    %391 = vector.extract_strided_slice %390 {offsets = [0, 0], sizes = [2, 32], strides = [1, 1]} : vector<2x96xf32> to vector<2x32xf32>
    %392 = vector.extract_strided_slice %389 {offsets = [0, 0], sizes = [2, 32], strides = [1, 1]} : vector<2x96xf32> to vector<2x32xf32>
    %393 = arith.addf %391, %392 : vector<2x32xf32>
    %394 = arith.negf %393 : vector<2x32xf32>
    %395 = math.exp %394 : vector<2x32xf32>
    %cst_90 = arith.constant 1.000000e+00 : f32
    %396 = vector.broadcast %cst_90 : f32 to vector<2x32xf32>
    %397 = arith.addf %396, %395 : vector<2x32xf32>
    %398 = arith.divf %396, %397 : vector<2x32xf32>
    %399 = vector.extract_strided_slice %390 {offsets = [0, 32], sizes = [2, 32], strides = [1, 1]} : vector<2x96xf32> to vector<2x32xf32>
    %400 = vector.extract_strided_slice %389 {offsets = [0, 32], sizes = [2, 32], strides = [1, 1]} : vector<2x96xf32> to vector<2x32xf32>
    %401 = arith.addf %399, %400 : vector<2x32xf32>
    %402 = arith.negf %401 : vector<2x32xf32>
    %403 = math.exp %402 : vector<2x32xf32>
    %cst_91 = arith.constant 1.000000e+00 : f32
    %404 = vector.broadcast %cst_91 : f32 to vector<2x32xf32>
    %405 = arith.addf %404, %403 : vector<2x32xf32>
    %406 = arith.divf %404, %405 : vector<2x32xf32>
    %407 = vector.extract_strided_slice %390 {offsets = [0, 64], sizes = [2, 32], strides = [1, 1]} : vector<2x96xf32> to vector<2x32xf32>
    %408 = vector.extract_strided_slice %389 {offsets = [0, 64], sizes = [2, 32], strides = [1, 1]} : vector<2x96xf32> to vector<2x32xf32>
    %409 = arith.mulf %398, %408 : vector<2x32xf32>
    %410 = arith.addf %407, %409 : vector<2x32xf32>
    %411 = math.tanh %410 : vector<2x32xf32>
    %cst_92 = arith.constant 1.000000e+00 : f32
    %412 = vector.broadcast %cst_92 : f32 to vector<2x32xf32>
    %413 = arith.subf %412, %406 : vector<2x32xf32>
    %414 = arith.mulf %413, %411 : vector<2x32xf32>
    %415 = arith.mulf %406, %387 : vector<2x32xf32>
    %416 = arith.addf %414, %415 : vector<2x32xf32>
    %c10_93 = arith.constant 10 : index
    %c0_94 = arith.constant 0 : index
    %417 = vector.load %arg9[%c10_93, %c0_94] : memref<16x32xf32, #tpu.memory_space<vmem>>, vector<2x32xf32>
    tpu.vector_store %arg9[%c10_93, %c0_94], %416 {strides = array<i32>} : memref<16x32xf32, #tpu.memory_space<vmem>>, vector<2x32xf32>,
    %cst_95 = arith.constant dense<0.000000e+00> : vector<2x96xf32>
    %418 = tpu.matmul %416, %241, %cst_95 {dimension_numbers = #tpu.dot_dimension_numbers<[1], [0], [0], [1], [0, 0, 1, 1], [], []>} : vector<2x32xf32>, vector<32x96xf32>, vector<2x96xf32> -> vector<2x96xf32>
    %419 = vector.extract_strided_slice %242 {offsets = [12, 0], sizes = [2, 96], strides = [1, 1]} : vector<16x96xf32> to vector<2x96xf32>
    %420 = vector.extract_strided_slice %419 {offsets = [0, 0], sizes = [2, 32], strides = [1, 1]} : vector<2x96xf32> to vector<2x32xf32>
    %421 = vector.extract_strided_slice %418 {offsets = [0, 0], sizes = [2, 32], strides = [1, 1]} : vector<2x96xf32> to vector<2x32xf32>
    %422 = arith.addf %420, %421 : vector<2x32xf32>
    %423 = arith.negf %422 : vector<2x32xf32>
    %424 = math.exp %423 : vector<2x32xf32>
    %cst_96 = arith.constant 1.000000e+00 : f32
    %425 = vector.broadcast %cst_96 : f32 to vector<2x32xf32>
    %426 = arith.addf %425, %424 : vector<2x32xf32>
    %427 = arith.divf %425, %426 : vector<2x32xf32>
    %428 = vector.extract_strided_slice %419 {offsets = [0, 32], sizes = [2, 32], strides = [1, 1]} : vector<2x96xf32> to vector<2x32xf32>
    %429 = vector.extract_strided_slice %418 {offsets = [0, 32], sizes = [2, 32], strides = [1, 1]} : vector<2x96xf32> to vector<2x32xf32>
    %430 = arith.addf %428, %429 : vector<2x32xf32>
    %431 = arith.negf %430 : vector<2x32xf32>
    %432 = math.exp %431 : vector<2x32xf32>
    %cst_97 = arith.constant 1.000000e+00 : f32
    %433 = vector.broadcast %cst_97 : f32 to vector<2x32xf32>
    %434 = arith.addf %433, %432 : vector<2x32xf32>
    %435 = arith.divf %433, %434 : vector<2x32xf32>
    %436 = vector.extract_strided_slice %419 {offsets = [0, 64], sizes = [2, 32], strides = [1, 1]} : vector<2x96xf32> to vector<2x32xf32>
    %437 = vector.extract_strided_slice %418 {offsets = [0, 64], sizes = [2, 32], strides = [1, 1]} : vector<2x96xf32> to vector<2x32xf32>
    %438 = arith.mulf %427, %437 : vector<2x32xf32>
    %439 = arith.addf %436, %438 : vector<2x32xf32>
    %440 = math.tanh %439 : vector<2x32xf32>
    %cst_98 = arith.constant 1.000000e+00 : f32
    %441 = vector.broadcast %cst_98 : f32 to vector<2x32xf32>
    %442 = arith.subf %441, %435 : vector<2x32xf32>
    %443 = arith.mulf %442, %440 : vector<2x32xf32>
    %444 = arith.mulf %435, %416 : vector<2x32xf32>
    %445 = arith.addf %443, %444 : vector<2x32xf32>
    %c12_99 = arith.constant 12 : index
    %c0_100 = arith.constant 0 : index
    %446 = vector.load %arg9[%c12_99, %c0_100] : memref<16x32xf32, #tpu.memory_space<vmem>>, vector<2x32xf32>
    tpu.vector_store %arg9[%c12_99, %c0_100], %445 {strides = array<i32>} : memref<16x32xf32, #tpu.memory_space<vmem>>, vector<2x32xf32>,
    %cst_101 = arith.constant dense<0.000000e+00> : vector<2x96xf32>
    %447 = tpu.matmul %445, %241, %cst_101 {dimension_numbers = #tpu.dot_dimension_numbers<[1], [0], [0], [1], [0, 0, 1, 1], [], []>} : vector<2x32xf32>, vector<32x96xf32>, vector<2x96xf32> -> vector<2x96xf32>
    %448 = vector.extract_strided_slice %242 {offsets = [14, 0], sizes = [2, 96], strides = [1, 1]} : vector<16x96xf32> to vector<2x96xf32>
    %449 = vector.extract_strided_slice %448 {offsets = [0, 0], sizes = [2, 32], strides = [1, 1]} : vector<2x96xf32> to vector<2x32xf32>
    %450 = vector.extract_strided_slice %447 {offsets = [0, 0], sizes = [2, 32], strides = [1, 1]} : vector<2x96xf32> to vector<2x32xf32>
    %451 = arith.addf %449, %450 : vector<2x32xf32>
    %452 = arith.negf %451 : vector<2x32xf32>
    %453 = math.exp %452 : vector<2x32xf32>
    %cst_102 = arith.constant 1.000000e+00 : f32
    %454 = vector.broadcast %cst_102 : f32 to vector<2x32xf32>
    %455 = arith.addf %454, %453 : vector<2x32xf32>
    %456 = arith.divf %454, %455 : vector<2x32xf32>
    %457 = vector.extract_strided_slice %448 {offsets = [0, 32], sizes = [2, 32], strides = [1, 1]} : vector<2x96xf32> to vector<2x32xf32>
    %458 = vector.extract_strided_slice %447 {offsets = [0, 32], sizes = [2, 32], strides = [1, 1]} : vector<2x96xf32> to vector<2x32xf32>
    %459 = arith.addf %457, %458 : vector<2x32xf32>
    %460 = arith.negf %459 : vector<2x32xf32>
    %461 = math.exp %460 : vector<2x32xf32>
    %cst_103 = arith.constant 1.000000e+00 : f32
    %462 = vector.broadcast %cst_103 : f32 to vector<2x32xf32>
    %463 = arith.addf %462, %461 : vector<2x32xf32>
    %464 = arith.divf %462, %463 : vector<2x32xf32>
    %465 = vector.extract_strided_slice %448 {offsets = [0, 64], sizes = [2, 32], strides = [1, 1]} : vector<2x96xf32> to vector<2x32xf32>
    %466 = vector.extract_strided_slice %447 {offsets = [0, 64], sizes = [2, 32], strides = [1, 1]} : vector<2x96xf32> to vector<2x32xf32>
    %467 = arith.mulf %456, %466 : vector<2x32xf32>
    %468 = arith.addf %465, %467 : vector<2x32xf32>
    %469 = math.tanh %468 : vector<2x32xf32>
    %cst_104 = arith.constant 1.000000e+00 : f32
    %470 = vector.broadcast %cst_104 : f32 to vector<2x32xf32>
    %471 = arith.subf %470, %464 : vector<2x32xf32>
    %472 = arith.mulf %471, %469 : vector<2x32xf32>
    %473 = arith.mulf %464, %445 : vector<2x32xf32>
    %474 = arith.addf %472, %473 : vector<2x32xf32>
    %c14_105 = arith.constant 14 : index
    %c0_106 = arith.constant 0 : index
    %475 = vector.load %arg9[%c14_105, %c0_106] : memref<16x32xf32, #tpu.memory_space<vmem>>, vector<2x32xf32>
    tpu.vector_store %arg9[%c14_105, %c0_106], %474 {strides = array<i32>} : memref<16x32xf32, #tpu.memory_space<vmem>>, vector<2x32xf32>,
    %c0_107 = arith.constant 0 : index
    %c0_108 = arith.constant 0 : index
    %476 = vector.load %arg9[%c0_107, %c0_108] : memref<16x32xf32, #tpu.memory_space<vmem>>, vector<16x32xf32>
    %cst_109 = arith.constant dense<0.000000e+00> : vector<16x16xf32>
    %477 = tpu.matmul %476, %0, %cst_109 {dimension_numbers = #tpu.dot_dimension_numbers<[1], [0], [0], [1], [0, 0, 1, 1], [], []>} : vector<16x32xf32>, vector<32x16xf32>, vector<16x16xf32> -> vector<16x16xf32>
    %cst_110 = arith.constant 0.000000e+00 : f32
    %478 = vector.broadcast %cst_110 : f32 to vector<16x16xf32>
    %479 = arith.maximumf %477, %478 : vector<16x16xf32>
    %480 = vector.broadcast %1 : vector<1x16xf32> to vector<16x16xf32>
    %481 = arith.mulf %479, %480 : vector<16x16xf32>
    %cst_111 = arith.constant dense<0.000000e+00> : vector<16xf32>
    %482 = vector.multi_reduction <add>, %481, %cst_111 [1] : vector<16x16xf32> to vector<16xf32>
    %483 = vector.shape_cast %482 : vector<16xf32> to vector<16x1xf32>
    %484 = vector.extract_strided_slice %483 {offsets = [0, 0], sizes = [2, 1], strides = [1, 1]} : vector<16x1xf32> to vector<2x1xf32>
    %c0_112 = arith.constant 0 : index
    %c0_113 = arith.constant 0 : index
    %485 = vector.load %arg8[%c0_112, %c0_113] : memref<2x8xf32, #tpu.memory_space<vmem>>, vector<2x1xf32>
    tpu.vector_store %arg8[%c0_112, %c0_113], %484 {strides = array<i32>} : memref<2x8xf32, #tpu.memory_space<vmem>>, vector<2x1xf32>,
    %486 = vector.extract_strided_slice %483 {offsets = [2, 0], sizes = [2, 1], strides = [1, 1]} : vector<16x1xf32> to vector<2x1xf32>
    %c0_114 = arith.constant 0 : index
    %c1 = arith.constant 1 : index
    %487 = vector.load %arg8[%c0_114, %c1] : memref<2x8xf32, #tpu.memory_space<vmem>>, vector<2x1xf32>
    tpu.vector_store %arg8[%c0_114, %c1], %486 {strides = array<i32>} : memref<2x8xf32, #tpu.memory_space<vmem>>, vector<2x1xf32>,
    %488 = vector.extract_strided_slice %483 {offsets = [4, 0], sizes = [2, 1], strides = [1, 1]} : vector<16x1xf32> to vector<2x1xf32>
    %c0_115 = arith.constant 0 : index
    %c2_116 = arith.constant 2 : index
    %489 = vector.load %arg8[%c0_115, %c2_116] : memref<2x8xf32, #tpu.memory_space<vmem>>, vector<2x1xf32>
    tpu.vector_store %arg8[%c0_115, %c2_116], %488 {strides = array<i32>} : memref<2x8xf32, #tpu.memory_space<vmem>>, vector<2x1xf32>,
    %490 = vector.extract_strided_slice %483 {offsets = [6, 0], sizes = [2, 1], strides = [1, 1]} : vector<16x1xf32> to vector<2x1xf32>
    %c0_117 = arith.constant 0 : index
    %c3 = arith.constant 3 : index
    %491 = vector.load %arg8[%c0_117, %c3] : memref<2x8xf32, #tpu.memory_space<vmem>>, vector<2x1xf32>
    tpu.vector_store %arg8[%c0_117, %c3], %490 {strides = array<i32>} : memref<2x8xf32, #tpu.memory_space<vmem>>, vector<2x1xf32>,
    %492 = vector.extract_strided_slice %483 {offsets = [8, 0], sizes = [2, 1], strides = [1, 1]} : vector<16x1xf32> to vector<2x1xf32>
    %c0_118 = arith.constant 0 : index
    %c4_119 = arith.constant 4 : index
    %493 = vector.load %arg8[%c0_118, %c4_119] : memref<2x8xf32, #tpu.memory_space<vmem>>, vector<2x1xf32>
    tpu.vector_store %arg8[%c0_118, %c4_119], %492 {strides = array<i32>} : memref<2x8xf32, #tpu.memory_space<vmem>>, vector<2x1xf32>,
    %494 = vector.extract_strided_slice %483 {offsets = [10, 0], sizes = [2, 1], strides = [1, 1]} : vector<16x1xf32> to vector<2x1xf32>
    %c0_120 = arith.constant 0 : index
    %c5 = arith.constant 5 : index
    %495 = vector.load %arg8[%c0_120, %c5] : memref<2x8xf32, #tpu.memory_space<vmem>>, vector<2x1xf32>
    tpu.vector_store %arg8[%c0_120, %c5], %494 {strides = array<i32>} : memref<2x8xf32, #tpu.memory_space<vmem>>, vector<2x1xf32>,
    %496 = vector.extract_strided_slice %483 {offsets = [12, 0], sizes = [2, 1], strides = [1, 1]} : vector<16x1xf32> to vector<2x1xf32>
    %c0_121 = arith.constant 0 : index
    %c6_122 = arith.constant 6 : index
    %497 = vector.load %arg8[%c0_121, %c6_122] : memref<2x8xf32, #tpu.memory_space<vmem>>, vector<2x1xf32>
    tpu.vector_store %arg8[%c0_121, %c6_122], %496 {strides = array<i32>} : memref<2x8xf32, #tpu.memory_space<vmem>>, vector<2x1xf32>,
    %498 = vector.extract_strided_slice %483 {offsets = [14, 0], sizes = [2, 1], strides = [1, 1]} : vector<16x1xf32> to vector<2x1xf32>
    %c0_123 = arith.constant 0 : index
    %c7 = arith.constant 7 : index
    %499 = vector.load %arg8[%c0_123, %c7] : memref<2x8xf32, #tpu.memory_space<vmem>>, vector<2x1xf32>
    tpu.vector_store %arg8[%c0_123, %c7], %498 {strides = array<i32>} : memref<2x8xf32, #tpu.memory_space<vmem>>, vector<2x1xf32>,
    return
  }
  func.func @transform_0(%arg0: i32) -> (i32, i32) {
    %c0_i32 = arith.constant 0 : i32
    %c0_i32_0 = arith.constant 0 : i32
    %c0_i32_1 = arith.constant 0 : i32
    return %c0_i32, %c0_i32_0 : i32, i32
  }
  func.func @transform_1(%arg0: i32) -> (i32, i32) {
    %c0_i32 = arith.constant 0 : i32
    %c0_i32_0 = arith.constant 0 : i32
    %c0_i32_1 = arith.constant 0 : i32
    return %c0_i32, %c0_i32_0 : i32, i32
  }
  func.func @transform_2(%arg0: i32) -> (i32, i32) {
    %c0_i32 = arith.constant 0 : i32
    %c0_i32_0 = arith.constant 0 : i32
    %c0_i32_1 = arith.constant 0 : i32
    return %c0_i32, %c0_i32_0 : i32, i32
  }
  func.func @transform_3(%arg0: i32) -> (i32, i32) {
    %c0_i32 = arith.constant 0 : i32
    %c0_i32_0 = arith.constant 0 : i32
    %c0_i32_1 = arith.constant 0 : i32
    return %c0_i32, %c0_i32_0 : i32, i32
  }
  func.func @transform_4(%arg0: i32) -> (i32, i32) {
    %c0_i32 = arith.constant 0 : i32
    %c0_i32_0 = arith.constant 0 : i32
    %c0_i32_1 = arith.constant 0 : i32
    return %c0_i32, %c0_i32_0 : i32, i32
  }
  func.func @transform_5(%arg0: i32) -> (i32, i32) {
    %c0_i32 = arith.constant 0 : i32
    %c0_i32_0 = arith.constant 0 : i32
    %c0_i32_1 = arith.constant 0 : i32
    return %c0_i32, %c0_i32_0 : i32, i32
  }
  func.func @transform_6(%arg0: i32) -> (i32, i32) {
    %c0_i32 = arith.constant 0 : i32
    %c0_i32_0 = arith.constant 0 : i32
    %c0_i32_1 = arith.constant 0 : i32
    return %c0_i32, %c0_i32_0 : i32, i32
  }
  func.func @transform_7(%arg0: i32) -> (i32, i32) {
    %c0_i32 = arith.constant 0 : i32
    %c0_i32_0 = arith.constant 0 : i32
    %c0_i32_1 = arith.constant 0 : i32
    return %c0_i32, %c0_i32_0 : i32, i32
  }
}

</mosaic_0001>

<bundles_post_ra>
// kernel: author_classifier_forward.1
= control target key start
LH: loop header
LB: loop body
LE: loop exit
PB: predicated region body
PF: predicated region fallthrough
CT: control target
= control target key end

     0   :  { %12 = vsyncpa [#allocation4], 0  ;;  %s3095_s0 = inlined_call_operand.vmem [shape: f32[16,32], index: 0, kind: input, shape index: {}]   ;;  %s3096_s1 = inlined_call_operand.vmem [shape: f32[32,96], index: 1, kind: input, shape index: {}]   ;;  %s3097_s2 = inlined_call_operand.vmem [shape: f32[32,96], index: 2, kind: input, shape index: {}]   ;;  %s3098_s3 = inlined_call_operand.hbm [shape: f32[32,96], index: 3, kind: input, shape index: {}]   ;;  %s3099_s4 = inlined_call_operand.hbm [shape: f32[32,96], index: 4, kind: input, shape index: {}]   ;;  %s3100_s5 = inlined_call_operand.vmem [shape: f32[32,16], index: 5, kind: input, shape index: {}]   ;;  %s3101_s6 = inlined_call_operand.vmem [shape: f32[1,16], index: 6, kind: input, shape index: {}]   ;;  %s3102_s7 = inlined_call_operand.hbm [shape: f32[2,8], index: 7, kind: output, shape index: {}]  }
   0x1   :  { %13 = vsyncpa [#allocation7], 0 }
   0x2   :  { %14 = vsyncpa [#allocation5], 0  ;;  %s2621_s24 = smov [#allocation3]  }
   0x3   :  { %s26_s25 = sshll.u32 %s2621_s24, 4  ;;  %s27_s25 = int_to_ptr.vmem [resolvable:$true] %s26_s25 }
   0x4   :  { %s2563_s26 = scalar_lea.vmem %s27_s25, 512  ;;  %p2568_p1 = scmp.lt.s32.totalorder %s27_s25, %s27_s25 }
   0x5   :  { %p2564_p0 = scmp.ne.s32.totalorder %s27_s25, %s2563_s26  ;;  %p2569_p2 = scmp.lt.s32.totalorder %s2563_s26, %s2563_s26 }
   0x7   :  { %p2570_p3 = por %p2569_p2, %p2568_p1 }
   0x9   :  { %p2571_p4 = pnand %p2570_p3, %p2564_p0 }
   0xb   :  { %2574 = shalt.err (!%p2571_p4)
}
   0xc   :  { %s2622_s27 = smov 128   ;;  %s2623_s28 = smov 8  }
   0xd   :  { %32 = dma.hbm_to_vmem [thread:$0]  %s3098_s3, 512, %s27_s25, [#allocation4], %s2622_s27, %s2622_s27, %s2623_s28  }
   0xe   :  { %s2624_s8 = smov [#allocation6]  }
   0xf   :  { %s38_s9 = sshll.u32 %s2624_s8, 4  ;;  %s39_s9 = int_to_ptr.vmem [resolvable:$true] %s38_s9 }
  0x10   :  { %s2583_s10 = scalar_lea.vmem %s39_s9, 512  ;;  %p2588_p6 = scmp.lt.s32.totalorder %s39_s9, %s39_s9 }
  0x11   :  { %p2584_p5 = scmp.ne.s32.totalorder %s39_s9, %s2583_s10  ;;  %p2589_p7 = scmp.lt.s32.totalorder %s2583_s10, %s2583_s10 }
  0x13   :  { %p2590_p8 = por %p2589_p7, %p2588_p6 }
  0x15   :  { %p2591_p9 = pnand %p2590_p8, %p2584_p5 }
  0x17   :  { %2594 = shalt.err (!%p2591_p9)
}
  0x18   :  { %44 = dma.hbm_to_vmem [thread:$0]  %s3099_s4, 512, %s39_s9, [#allocation7], %s2622_s27, %s2622_s27, %s2623_s28  }
  0x19   :  { %2615 = dma.done.wait [#allocation4], 512  }
  0x1a   :  { %2616 = vsyncadd [#allocation4], 4294966784 }
  0x1b   :  { %2617 = dma.done.wait [#allocation7], 512  }
  0x1c   :  { %2618 = vsyncadd [#allocation7], 4294966784  ;;  %v2625_v0 = vmov 0.0   ;;  %vm2626_vm0 = vmmov 0   ;;  %v65_v1 = vld [vmem:[%s3096_s1 + $0x18] sm:$0xff]  ;;  %v64_v3 = vld [vmem:[%s3096_s1 + $0x10] sm:$0xff] }
  0x1d   :  { %2252 = vmatprep.subr.mxu1 %v2625_v0  ;;  %2260 = vmatprep.mubr.msk.f32.mxu1 %vm2626_vm0, %v2625_v0  ;;  %v2685_v2 = vld [vmem:[%s3097_s2 + $0x18] sm:$0xff]  ;;  %v2694_v4 = vld [vmem:[%s3097_s2 + $0x10] sm:$0xff]  ;;  %v63_v5 = vld [vmem:[%s3096_s1 + $0x8] sm:$0xff]  ;;  %vm70_vm1 = vcmask 261120   ;;  %vm255_vm2 = vcmask 254976   ;;  %vm363_vm3 = vcmask 257026  }
  0x1e   :  { %2241 = vmatprep.subr.mxu0 %v65_v1  ;;  %2253 = vmatpush3.msra.mxu1 %v2685_v2  ;;  %v2703_v6 = vld [vmem:[%s3097_s2 + $0x8] sm:$0xff]  ;;  %v62_v7 = vld [vmem:[%s3096_s1] sm:$0xff]  ;;  %s2628_s1 = smov 96   ;;  %vm585_vm4 = vcmask 261126   ;;  %vm474_vm5 = vcmask 259076   ;;  %vm2067_vm6 = vcmask 130048  }
  0x1f   :  { %2242 = vmatpush3.msra.mxu0 %v65_v1  ;;  %2254 = vmatprep.subr.mxu1 %v2625_v0  ;;  %v2713_v8 = vld [vmem:[%s3097_s2] sm:$0xff]  ;;  %v61_v10 = vld [vmem:[%s3095_s0 + $0x8] sm:$0xff]  ;;  %vm2074_vm7 = vcmask 1024   ;;  %vm2076_vm8 = vcmask 11274   ;;  %vm2078_vm9 = vcmask 21524   ;;  %vm2080_vm10 = vcmask 31774  }
  0x20   :  { %2243 = vmatprep.subr.mxu0 %v64_v3  ;;  %2255 = vmatpush3.msra.mxu1 %v2694_v4  ;;  %v60_v9 = vld [vmem:[%s3095_s0] sm:$0xff]  ;;  %s2627_s0 = smov 64   ;;  %vm2082_vm11 = vcmask 33824   ;;  %vm2084_vm12 = vcmask 44074   ;;  %vm2086_vm13 = vcmask 54324   ;;  %vm2088_vm14 = vcmask 64574  }
  0x21   :  { %2244 = vmatpush3.msra.mxu0 %v64_v3  ;;  %2256 = vmatprep.subr.mxu1 %v2625_v0 }
  0x22   :  { %2245 = vmatprep.subr.mxu0 %v63_v5  ;;  %2257 = vmatpush3.msra.mxu1 %v2703_v6 }
  0x23   :  { %2246 = vmatpush3.msra.mxu0 %v63_v5  ;;  %2258 = vmatprep.subr.mxu1 %v2625_v0 }
  0x24   :  { %2247 = vmatprep.subr.mxu0 %v62_v7  ;;  %2259 = vmatpush3.msra.mxu1 %v2713_v8 }
  0x25   :  { %2248 = vmatpush3.msra.mxu0 %v62_v7  ;;  %2249 = vmatprep.mubr.msk.f32.mxu0 %vm70_vm1, %v60_v9 }
  0x26   :  { %2261 = vmatmul.mubr.f32.vlgmr.msra.gmra.mxu1 %v2625_v0  ;;  %2250 = vmatmul.mubr.msk.f32.vlgmr.msra.gmra.mxu0 %vm70_vm1, %v61_v10 }
  0x27   :  { %2263 = vmatprep.subr.mxu0 %v2625_v0  ;;  %2271 = vmatprep.mubr.msk.f32.mxu0 %vm2626_vm0, %v2625_v0 }
  0x28   :  { %2264 = vmatpush3.msra.mxu0 %v2685_v2  ;;  %2274 = vmatprep.subr.mxu1 %v2625_v0 }
  0x29   :  { %2265 = vmatprep.subr.mxu0 %v2625_v0  ;;  %2275 = vmatpush3.msra.mxu1 %v2685_v2 }
  0x2a   :  { %2266 = vmatpush3.msra.mxu0 %v2694_v4  ;;  %2276 = vmatprep.subr.mxu1 %v2625_v0 }
  0x2b   :  { %2267 = vmatprep.subr.mxu0 %v2625_v0  ;;  %2277 = vmatpush3.msra.mxu1 %v2694_v4 }
  0x2c   :  { %2268 = vmatpush3.msra.mxu0 %v2703_v6  ;;  %2278 = vmatprep.subr.mxu1 %v2625_v0 }
  0x2d   :  { %2269 = vmatprep.subr.mxu0 %v2625_v0  ;;  %2279 = vmatpush3.msra.mxu1 %v2703_v6 }
  0x2e   :  { %2270 = vmatpush3.msra.mxu0 %v2713_v8  ;;  %2280 = vmatprep.subr.mxu1 %v2625_v0 }
  0x2f   :  { %2281 = vmatpush3.msra.mxu1 %v2713_v8  ;;  %2282 = vmatprep.mubr.msk.f32.mxu1 %vm2626_vm0, %v2625_v0 }
  0x30   :  { %2285 = vmatprep.subr.mxu0 %v2625_v0  ;;  %2296 = vmatprep.subr.mxu1 %v2625_v0 }
  0xe6   :  { %v221_v11 = vpop.f32.mrf.mxu1  ;;  %v2750_v13 = vpop.f32.mrf.mxu0 }
  0xe7   :  { %233 = vrot.lane.b32.xlu0 %v221_v11, %s2627_s0 }
  0xe8   :  { %v2262_v12 = vpop.f32.mrf.mxu1  ;;  %v2752_v14 = vpop.f32.mrf.mxu0 }
  0xe9   :  { %v225_v15 = vadd.f32 %v221_v11, %v2752_v14 }
  0xeb   :  { %v2108_v16 = vmul.f32 -1.442695, %v225_v15 }
  0xed   :  { %2459 = vpow2.f32 %v2108_v16 }
  0xfa   :  { %v2460_v17 = vpop.eup %2459 }
  0xfb   :  { %v229_v18 = vadd.f32 1.0, %v2460_v17 }
  0xfd   :  { %2461 = vrcp.f32 %v229_v18 }
 0x10a   :  { %v2462_v19 = vpop.eup %2461 }
 0x10b   :  { %v243_v25 = vsub.f32 1.0, %v2462_v19  ;;  %v249_v27 = vmul.f32 0.0, %v2462_v19 }
 0x159   :  { %v234_v20 = vpop.permute.xlu0 %233 }
 0x15a   :  { %v236_v21 = vmul.f32 %v2462_v19, %v234_v20 }
 0x15c   :  { %238 = vrot.lane.b32.xlu0 %v236_v21, %s2627_s0 }
 0x1ce   :  { %v239_v22 = vpop.permute.xlu0 %238 }
 0x1cf   :  { %v241_v23 = vadd.f32 %v239_v22, %v2752_v14 }
 0x1d1   :  { %2463 = vtanh.f32 %v241_v23 }
 0x1de   :  { %v2464_v24 = vpop.eup %2463 }
 0x1df   :  { %245 = vrot.lane.b32.xlu1 %v2464_v24, %s2628_s1 }
 0x251   :  { %v246_v26 = vpop.permute.xlu1 %245 }
 0x252   :  { %v248_v28 = vmul.f32 %v246_v26, %v243_v25 }
 0x254   :  { %v250_v29 = vadd.f32 %v249_v27, %v248_v28 }
 0x256   :  { %252 = vrot.lane.b32.xlu1 %v250_v29, %s2628_s1  ;;  %v355_v44 = vrot.slane %v250_v29, 6 }
 0x2c8   :  { %v253_v30 = vpop.permute.xlu1 %252 }
 0x2c9   :  { %256 = vst.msk [vmem:[#allocation2] sm:$0x3] %vm255_vm2, %v253_v30  ;;  %2272 = vmatmul.mubr.msk.f32.vlgmr.msra.gmra.mxu0 %vm70_vm1, %v253_v30 }
 0x2ca   :  { %2286 = vmatpush3.msra.mxu0 %v2685_v2  ;;  %2293 = vmatprep.mubr.msk.f32.mxu0 %vm2626_vm0, %v2625_v0 }
 0x2cb   :  { %2287 = vmatprep.subr.mxu0 %v2625_v0 }
 0x2cc   :  { %2288 = vmatpush3.msra.mxu0 %v2694_v4 }
 0x2cd   :  { %2289 = vmatprep.subr.mxu0 %v2625_v0 }
 0x2ce   :  { %2290 = vmatpush3.msra.mxu0 %v2703_v6 }
 0x2cf   :  { %2291 = vmatprep.subr.mxu0 %v2625_v0 }
 0x2d0   :  { %2292 = vmatpush3.msra.mxu0 %v2713_v8 }
 0x2d1   :  { %2307 = vmatprep.subr.mxu0 %v2625_v0 }
 0x389   :  { %v325_v31 = vpop.f32.mrf.mxu0 }
 0x38a   :  { %v330_v32 = vrot.slane %v325_v31, 6 }
 0x38b   :  { %v2273_v33 = vpop.f32.mrf.mxu0 }
 0x38c   :  { %339 = vrot.lane.b32.xlu0 %v330_v32, %s2627_s0  ;;  %v332_v34 = vadd.f32 %v330_v32, %v2752_v14 }
 0x38e   :  { %v2110_v35 = vmul.f32 -1.442695, %v332_v34 }
 0x390   :  { %2465 = vpow2.f32 %v2110_v35 }
 0x39d   :  { %v2466_v36 = vpop.eup %2465 }
 0x39e   :  { %v336_v37 = vadd.f32 1.0, %v2466_v36 }
 0x3a0   :  { %2467 = vrcp.f32 %v336_v37 }
 0x3ad   :  { %v2468_v38 = vpop.eup %2467 }
 0x3ae   :  { %v349_v45 = vsub.f32 1.0, %v2468_v38  ;;  %v357_v48 = vmul.f32 %v2468_v38, %v355_v44 }
 0x3fe   :  { %v340_v39 = vpop.permute.xlu0 %339 }
 0x3ff   :  { %v342_v40 = vmul.f32 %v2468_v38, %v340_v39 }
 0x401   :  { %344 = vrot.lane.b32.xlu1 %v342_v40, %s2627_s0 }
 0x473   :  { %v345_v41 = vpop.permute.xlu1 %344 }
 0x474   :  { %v347_v42 = vadd.f32 %v345_v41, %v2752_v14 }
 0x476   :  { %2469 = vtanh.f32 %v347_v42 }
 0x483   :  { %v2470_v43 = vpop.eup %2469 }
 0x484   :  { %351 = vrot.lane.b32.xlu0 %v2470_v43, %s2628_s1 }
 0x4f6   :  { %v352_v46 = vpop.permute.xlu0 %351 }
 0x4f7   :  { %v354_v47 = vmul.f32 %v352_v46, %v349_v45 }
 0x4f9   :  { %v2776_v49 = vadd.f32 %v357_v48, %v354_v47 }
 0x4fb   :  { %v365_v50 = vrot.slane %v2776_v49, 2  ;;  %v466_v5 = vrot.slane %v2776_v49, 6 }
 0x4fd   :  { %366 = vrot.lane.b32.xlu1 %v365_v50, %s2628_s1 }
 0x56f   :  { %v367_v51 = vpop.permute.xlu1 %366 }
 0x570   :  { %2283 = vmatmul.mubr.msk.f32.vlgmr.msra.gmra.mxu1 %vm70_vm1, %v367_v51 }
 0x571   :  { %2297 = vmatpush3.msra.mxu1 %v2685_v2  ;;  %2304 = vmatprep.mubr.msk.f32.mxu1 %vm2626_vm0, %v2625_v0 }
 0x572   :  { %2298 = vmatprep.subr.mxu1 %v2625_v0 }
 0x573   :  { %2299 = vmatpush3.msra.mxu1 %v2694_v4 }
 0x574   :  { %2300 = vmatprep.subr.mxu1 %v2625_v0 }
 0x575   :  { %2301 = vmatpush3.msra.mxu1 %v2703_v6 }
 0x576   :  { %2302 = vmatprep.subr.mxu1 %v2625_v0 }
 0x577   :  { %2303 = vmatpush3.msra.mxu1 %v2713_v8 }
 0x578   :  { %2318 = vmatprep.subr.mxu1 %v2625_v0 }
 0x630   :  { %v436_v52 = vpop.f32.mrf.mxu1 }
 0x631   :  { %v441_v53 = vrot.slane %v436_v52, 4 }
 0x632   :  { %v2284_v54 = vpop.f32.mrf.mxu1 }
 0x633   :  { %450 = vrot.lane.b32.xlu0 %v441_v53, %s2627_s0  ;;  %v443_v55 = vadd.f32 %v441_v53, %v2752_v14 }
 0x635   :  { %v2112_v56 = vmul.f32 -1.442695, %v443_v55 }
 0x637   :  { %2471 = vpow2.f32 %v2112_v56 }
 0x644   :  { %v2472_v57 = vpop.eup %2471 }
 0x645   :  { %v447_v58 = vadd.f32 1.0, %v2472_v57 }
 0x647   :  { %2473 = vrcp.f32 %v447_v58 }
 0x654   :  { %v2474_v59 = vpop.eup %2473 }
 0x655   :  { %v460_v3 = vsub.f32 1.0, %v2474_v59  ;;  %v468_v9 = vmul.f32 %v2474_v59, %v466_v5 }
 0x6a5   :  { %v451_v60 = vpop.permute.xlu0 %450 }
 0x6a6   :  { %v453_v61 = vmul.f32 %v2474_v59, %v451_v60 }
 0x6a8   :  { %455 = vrot.lane.b32.xlu1 %v453_v61, %s2627_s0 }
 0x71a   :  { %v456_v62 = vpop.permute.xlu1 %455 }
 0x71b   :  { %v458_v63 = vadd.f32 %v456_v62, %v2752_v14 }
 0x71d   :  { %2475 = vtanh.f32 %v458_v63 }
 0x72a   :  { %v2476_v1 = vpop.eup %2475 }
 0x72b   :  { %462 = vrot.lane.b32.xlu0 %v2476_v1, %s2628_s1 }
 0x79d   :  { %v463_v7 = vpop.permute.xlu0 %462 }
 0x79e   :  { %v465_v10 = vmul.f32 %v463_v7, %v460_v3 }
 0x7a0   :  { %v2797_v11 = vadd.f32 %v468_v9, %v465_v10 }
 0x7a2   :  { %v476_v12 = vrot.slane %v2797_v11, 4  ;;  %v577_v30 = vrot.slane %v2797_v11, 6 }
 0x7a4   :  { %477 = vrot.lane.b32.xlu1 %v476_v12, %s2628_s1 }
 0x816   :  { %v478_v15 = vpop.permute.xlu1 %477 }
 0x817   :  { %2294 = vmatmul.mubr.msk.f32.vlgmr.msra.gmra.mxu0 %vm70_vm1, %v478_v15 }
 0x818   :  { %2308 = vmatpush3.msra.mxu0 %v2685_v2  ;;  %2315 = vmatprep.mubr.msk.f32.mxu0 %vm2626_vm0, %v2625_v0 }
 0x819   :  { %2309 = vmatprep.subr.mxu0 %v2625_v0 }
 0x81a   :  { %2310 = vmatpush3.msra.mxu0 %v2694_v4 }
 0x81b   :  { %2311 = vmatprep.subr.mxu0 %v2625_v0 }
 0x81c   :  { %2312 = vmatpush3.msra.mxu0 %v2703_v6 }
 0x81d   :  { %2313 = vmatprep.subr.mxu0 %v2625_v0 }
 0x81e   :  { %2314 = vmatpush3.msra.mxu0 %v2713_v8 }
 0x81f   :  { %2329 = vmatprep.subr.mxu0 %v2625_v0 }
 0x8d7   :  { %v547_v16 = vpop.f32.mrf.mxu0 }
 0x8d8   :  { %v552_v17 = vrot.slane %v547_v16, 2 }
 0x8d9   :  { %v2295_v18 = vpop.f32.mrf.mxu0 }
 0x8da   :  { %561 = vrot.lane.b32.xlu0 %v552_v17, %s2627_s0  ;;  %v554_v19 = vadd.f32 %v552_v17, %v2752_v14 }
 0x8dc   :  { %v2114_v20 = vmul.f32 -1.442695, %v554_v19 }
 0x8de   :  { %2477 = vpow2.f32 %v2114_v20 }
 0x8eb   :  { %v2478_v21 = vpop.eup %2477 }
 0x8ec   :  { %v558_v22 = vadd.f32 1.0, %v2478_v21 }
 0x8ee   :  { %2479 = vrcp.f32 %v558_v22 }
 0x8fb   :  { %v2480_v23 = vpop.eup %2479 }
 0x8fc   :  { %v571_v29 = vsub.f32 1.0, %v2480_v23  ;;  %v579_v32 = vmul.f32 %v2480_v23, %v577_v30 }
 0x94c   :  { %v562_v24 = vpop.permute.xlu0 %561 }
 0x94d   :  { %v564_v25 = vmul.f32 %v2480_v23, %v562_v24 }
 0x94f   :  { %566 = vrot.lane.b32.xlu1 %v564_v25, %s2627_s0 }
 0x9c1   :  { %v567_v26 = vpop.permute.xlu1 %566 }
 0x9c2   :  { %v569_v27 = vadd.f32 %v567_v26, %v2752_v14 }
 0x9c4   :  { %2481 = vtanh.f32 %v569_v27 }
 0x9d1   :  { %v2482_v28 = vpop.eup %2481 }
 0x9d2   :  { %573 = vrot.lane.b32.xlu0 %v2482_v28, %s2628_s1 }
 0xa44   :  { %v574_v31 = vpop.permute.xlu0 %573 }
 0xa45   :  { %v576_v33 = vmul.f32 %v574_v31, %v571_v29 }
 0xa47   :  { %v2818_v34 = vadd.f32 %v579_v32, %v576_v33 }
 0xa49   :  { %v587_v35 = vrot.slane %v2818_v34, 6 }
 0xa4b   :  { %588 = vrot.lane.b32.xlu1 %v587_v35, %s2628_s1 }
 0xabd   :  { %v589_v36 = vpop.permute.xlu1 %588 }
 0xabe   :  { %2305 = vmatmul.mubr.msk.f32.vlgmr.msra.gmra.mxu1 %vm70_vm1, %v589_v36 }
 0xabf   :  { %2319 = vmatpush3.msra.mxu1 %v2685_v2  ;;  %2326 = vmatprep.mubr.msk.f32.mxu1 %vm2626_vm0, %v2625_v0 }
 0xac0   :  { %2320 = vmatprep.subr.mxu1 %v2625_v0 }
 0xac1   :  { %2321 = vmatpush3.msra.mxu1 %v2694_v4 }
 0xac2   :  { %2322 = vmatprep.subr.mxu1 %v2625_v0 }
 0xac3   :  { %2323 = vmatpush3.msra.mxu1 %v2703_v6 }
 0xac4   :  { %2324 = vmatprep.subr.mxu1 %v2625_v0 }
 0xac5   :  { %2325 = vmatpush3.msra.mxu1 %v2713_v8 }
 0xb7e   :  { %v658_v14 = vpop.f32.mrf.mxu1 }
 0xb7f   :  { %670 = vrot.lane.b32.xlu0 %v658_v14, %s2627_s0  ;;  %v662_v38 = vadd.f32 %v2750_v13, %v658_v14 }
 0xb80   :  { %v2306_v37 = vpop.f32.mrf.mxu1 }
 0xb81   :  { %v2116_v39 = vmul.f32 -1.442695, %v662_v38 }
 0xb83   :  { %2483 = vpow2.f32 %v2116_v39 }
 0xb90   :  { %v2484_v40 = vpop.eup %2483 }
 0xb91   :  { %v666_v41 = vadd.f32 1.0, %v2484_v40 }
 0xb93   :  { %2485 = vrcp.f32 %v666_v41 }
 0xba0   :  { %v2486_v42 = vpop.eup %2485 }
 0xba1   :  { %v680_v48 = vsub.f32 1.0, %v2486_v42  ;;  %v687_v51 = vmul.f32 %v2486_v42, %v587_v35 }
 0xbf1   :  { %v671_v43 = vpop.permute.xlu0 %670 }
 0xbf2   :  { %v673_v44 = vmul.f32 %v2486_v42, %v671_v43 }
 0xbf4   :  { %675 = vrot.lane.b32.xlu1 %v673_v44, %s2627_s0 }
 0xc66   :  { %v676_v45 = vpop.permute.xlu1 %675 }
 0xc67   :  { %v678_v46 = vadd.f32 %v2750_v13, %v676_v45 }
 0xc69   :  { %2487 = vtanh.f32 %v678_v46 }
 0xc76   :  { %v2488_v47 = vpop.eup %2487 }
 0xc77   :  { %682 = vrot.lane.b32.xlu0 %v2488_v47, %s2628_s1 }
 0xce9   :  { %v683_v50 = vpop.permute.xlu0 %682 }
 0xcea   :  { %v685_v52 = vmul.f32 %v683_v50, %v680_v48 }
 0xcec   :  { %v688_v53 = vadd.f32 %v687_v51, %v685_v52  ;;  %v2889_v52 = vld [vmem:[#allocation6 + $0x18] sm:$0xff] }
 0xcee   :  { %690 = vrot.lane.b32.xlu1 %v688_v53, %s2628_s1  ;;  %v792_v1 = vrot.slane %v688_v53, 6  ;;  %v2891_v53 = vld [vmem:[#allocation6 + $0x10] sm:$0xff] }
 0xd60   :  { %v691_v54 = vpop.permute.xlu1 %690 }
 0xd61   :  { %693 = vst.msk [vmem:[#allocation2 + $0x8] sm:$0x3] %vm255_vm2, %v691_v54  ;;  %2316 = vmatmul.mubr.msk.f32.vlgmr.msra.gmra.mxu0 %vm70_vm1, %v691_v54  ;;  %v2900_v54 = vld [vmem:[#allocation6] sm:$0xff] }
 0xd62   :  { %2330 = vmatpush3.msra.mxu0 %v2685_v2  ;;  %2337 = vmatprep.mubr.msk.f32.mxu0 %vm2626_vm0, %v2625_v0 }
 0xd63   :  { %2331 = vmatprep.subr.mxu0 %v2625_v0 }
 0xd64   :  { %2332 = vmatpush3.msra.mxu0 %v2694_v4 }
 0xd65   :  { %2333 = vmatprep.subr.mxu0 %v2625_v0 }
 0xd66   :  { %2334 = vmatpush3.msra.mxu0 %v2703_v6 }
 0xd67   :  { %2335 = vmatprep.subr.mxu0 %v2625_v0 }
 0xd68   :  { %2336 = vmatpush3.msra.mxu0 %v2713_v8 }
 0xd69   :  { %2351 = vmatprep.subr.mxu0 %v2625_v0 }
 0xe21   :  { %v762_v55 = vpop.f32.mrf.mxu0 }
 0xe22   :  { %v767_v56 = vrot.slane %v762_v55, 6  ;;  %v1025_v55 = vld [vmem:[#allocation3 + $0x10] sm:$0xff] }
 0xe23   :  { %v2317_v2 = vpop.f32.mrf.mxu0 }
 0xe24   :  { %776 = vrot.lane.b32.xlu0 %v767_v56, %s2627_s0  ;;  %v769_v57 = vadd.f32 %v2750_v13, %v767_v56  ;;  %v1024_v56 = vld [vmem:[#allocation3 + $0x8] sm:$0xff]  ;;  %v1023_v2 = vld [vmem:[#allocation3] sm:$0xff] }
 0xe26   :  { %v2118_v58 = vmul.f32 -1.442695, %v769_v57 }
 0xe28   :  { %2489 = vpow2.f32 %v2118_v58 }
 0xe35   :  { %v2490_v4 = vpop.eup %2489 }
 0xe36   :  { %v773_v59 = vadd.f32 1.0, %v2490_v4 }
 0xe38   :  { %2491 = vrcp.f32 %v773_v59 }
 0xe45   :  { %v2492_v60 = vpop.eup %2491 }
 0xe46   :  { %v786_v3 = vsub.f32 1.0, %v2492_v60  ;;  %v794_v9 = vmul.f32 %v2492_v60, %v792_v1 }
 0xe96   :  { %v777_v6 = vpop.permute.xlu0 %776 }
 0xe97   :  { %v779_v61 = vmul.f32 %v2492_v60, %v777_v6 }
 0xe99   :  { %781 = vrot.lane.b32.xlu1 %v779_v61, %s2627_s0 }
 0xf0b   :  { %v782_v8 = vpop.permute.xlu1 %781 }
 0xf0c   :  { %v784_v62 = vadd.f32 %v2750_v13, %v782_v8 }
 0xf0e   :  { %2493 = vtanh.f32 %v784_v62 }
 0xf1b   :  { %v2494_v63 = vpop.eup %2493 }
 0xf1c   :  { %788 = vrot.lane.b32.xlu0 %v2494_v63, %s2628_s1 }
 0xf8e   :  { %v789_v5 = vpop.permute.xlu0 %788 }
 0xf8f   :  { %v791_v7 = vmul.f32 %v789_v5, %v786_v3 }
 0xf91   :  { %v2855_v10 = vadd.f32 %v794_v9, %v791_v7 }
 0xf93   :  { %v801_v12 = vrot.slane %v2855_v10, 2  ;;  %v902_v30 = vrot.slane %v2855_v10, 6 }
 0xf95   :  { %802 = vrot.lane.b32.xlu1 %v801_v12, %s2628_s1 }
0x1007   :  { %v803_v15 = vpop.permute.xlu1 %802 }
0x1008   :  { %2327 = vmatmul.mubr.msk.f32.vlgmr.msra.gmra.mxu1 %vm70_vm1, %v803_v15 }
0x10c8   :  { %v872_v16 = vpop.f32.mrf.mxu1 }
0x10c9   :  { %v877_v17 = vrot.slane %v872_v16, 4 }
0x10ca   :  { %v2328_v18 = vpop.f32.mrf.mxu1 }
0x10cb   :  { %886 = vrot.lane.b32.xlu0 %v877_v17, %s2627_s0  ;;  %v879_v19 = vadd.f32 %v2750_v13, %v877_v17 }
0x10cd   :  { %v2120_v20 = vmul.f32 -1.442695, %v879_v19 }
0x10cf   :  { %2495 = vpow2.f32 %v2120_v20 }
0x10dc   :  { %v2496_v21 = vpop.eup %2495 }
0x10dd   :  { %v883_v22 = vadd.f32 1.0, %v2496_v21 }
0x10df   :  { %2497 = vrcp.f32 %v883_v22 }
0x10ec   :  { %v2498_v23 = vpop.eup %2497 }
0x10ed   :  { %v896_v29 = vsub.f32 1.0, %v2498_v23  ;;  %v904_v32 = vmul.f32 %v2498_v23, %v902_v30 }
0x113d   :  { %v887_v24 = vpop.permute.xlu0 %886 }
0x113e   :  { %v889_v25 = vmul.f32 %v2498_v23, %v887_v24 }
0x1140   :  { %891 = vrot.lane.b32.xlu1 %v889_v25, %s2627_s0 }
0x11b2   :  { %v892_v26 = vpop.permute.xlu1 %891 }
0x11b3   :  { %v894_v27 = vadd.f32 %v2750_v13, %v892_v26 }
0x11b5   :  { %2499 = vtanh.f32 %v894_v27 }
0x11c2   :  { %v2500_v28 = vpop.eup %2499 }
0x11c3   :  { %898 = vrot.lane.b32.xlu0 %v2500_v28, %s2628_s1 }
0x1235   :  { %v899_v31 = vpop.permute.xlu0 %898 }
0x1236   :  { %v901_v33 = vmul.f32 %v899_v31, %v896_v29 }
0x1238   :  { %v2866_v35 = vadd.f32 %v904_v32, %v901_v33 }
0x123a   :  { %v911_v36 = vrot.slane %v2866_v35, 4  ;;  %v1012_v58 = vrot.slane %v2866_v35, 6 }
0x123c   :  { %912 = vrot.lane.b32.xlu1 %v911_v36, %s2628_s1 }
0x12ae   :  { %v913_v14 = vpop.permute.xlu1 %912 }
0x12af   :  { %2338 = vmatmul.mubr.msk.f32.vlgmr.msra.gmra.mxu0 %vm70_vm1, %v913_v14 }
0x12b0   :  { %2359 = vmatprep.mubr.msk.f32.mxu0 %vm2626_vm0, %v2625_v0  ;;  %2352 = vmatpush3.msra.mxu0 %v2889_v52 }
0x12b1   :  { %2353 = vmatprep.subr.mxu0 %v2625_v0 }
0x12b2   :  { %2354 = vmatpush3.msra.mxu0 %v2891_v53 }
0x12b3   :  { %2355 = vmatprep.subr.mxu0 %v2625_v0 }
0x136f   :  { %v982_v37 = vpop.f32.mrf.mxu0 }
0x1370   :  { %v987_v38 = vrot.slane %v982_v37, 2 }
0x1371   :  { %v2339_v39 = vpop.f32.mrf.mxu0 }
0x1372   :  { %996 = vrot.lane.b32.xlu0 %v987_v38, %s2627_s0  ;;  %v989_v40 = vadd.f32 %v2750_v13, %v987_v38 }
0x1374   :  { %v2122_v41 = vmul.f32 -1.442695, %v989_v40 }
0x1376   :  { %2501 = vpow2.f32 %v2122_v41 }
0x1383   :  { %v2502_v42 = vpop.eup %2501 }
0x1384   :  { %v993_v43 = vadd.f32 1.0, %v2502_v42 }
0x1386   :  { %2503 = vrcp.f32 %v993_v43 }
0x1393   :  { %v2875_v44 = vpop.eup %2503 }
0x1394   :  { %v1006_v57 = vsub.f32 1.0, %v2875_v44  ;;  %v1014_v59 = vmul.f32 %v2875_v44, %v1012_v58 }
0x13e4   :  { %v997_v45 = vpop.permute.xlu0 %996 }
0x13e5   :  { %v999_v46 = vmul.f32 %v2875_v44, %v997_v45 }
0x13e7   :  { %1001 = vrot.lane.b32.xlu1 %v999_v46, %s2627_s0 }
0x13eb   :  { %360 = vrot.lane.b32.xlu1 %v2776_v49, %s2628_s1 }
0x13ef   :  { %582 = vrot.lane.b32.xlu1 %v2818_v34, %s2628_s1 }
0x13f3   :  { %907 = vrot.lane.b32.xlu1 %v2866_v35, %s2628_s1 }
0x1459   :  { %v1002_v47 = vpop.permute.xlu1 %1001 }
0x145a   :  { %v1004_v48 = vadd.f32 %v2750_v13, %v1002_v47  ;;  %v2896_v13 = vld [vmem:[#allocation6 + $0x8] sm:$0xff] }
0x145b   :  { %2356 = vmatpush3.msra.mxu0 %v2896_v13 }
0x145c   :  { %2505 = vtanh.f32 %v1004_v48  ;;  %2357 = vmatprep.subr.mxu0 %v2625_v0 }
0x145d   :  { %v361_v50 = vpop.permute.xlu1 %360  ;;  %2358 = vmatpush3.msra.mxu0 %v2900_v54 }
0x145e   :  { %364 = vst.msk [vmem:[#allocation2] sm:$0xc] %vm363_vm3, %v361_v50  ;;  %2360 = vmatmul.mubr.f32.vlgmr.msra.gmra.mxu0 %v2625_v0  ;;  %2373 = vmatprep.subr.mxu0 %v2625_v0 }
0x145f   :  { %2374 = vmatpush3.msra.mxu0 %v2889_v52  ;;  %2381 = vmatprep.mubr.msk.f32.mxu0 %vm2626_vm0, %v2625_v0 }
0x1460   :  { %2375 = vmatprep.subr.mxu0 %v2625_v0 }
0x1461   :  { %v583_v51 = vpop.permute.xlu1 %582  ;;  %2376 = vmatpush3.msra.mxu0 %v2891_v53 }
0x1462   :  { %586 = vst.msk [vmem:[#allocation2] sm:$0xc0] %vm585_vm4, %v583_v51  ;;  %2377 = vmatprep.subr.mxu0 %v2625_v0 }
0x1463   :  { %2378 = vmatpush3.msra.mxu0 %v2896_v13 }
0x1464   :  { %2379 = vmatprep.subr.mxu0 %v2625_v0 }
0x1465   :  { %v908_v49 = vpop.permute.xlu1 %907  ;;  %2380 = vmatpush3.msra.mxu0 %v2900_v54 }
0x1466   :  { %910 = vst.msk [vmem:[#allocation2 + $0x8] sm:$0x30] %vm474_vm5, %v908_v49  ;;  %2395 = vmatprep.subr.mxu0 %v2625_v0 }
0x1469   :  { %v2506_v34 = vpop.eup %2505 }
0x146a   :  { %1008 = vrot.lane.b32.xlu0 %v2506_v34, %s2628_s1 }
0x146e   :  { %471 = vrot.lane.b32.xlu0 %v2797_v11, %s2628_s1  ;;  %v1026_v11 = vld [vmem:[#allocation3 + $0x18] sm:$0xff] }
0x146f   :  { %2340 = vmatprep.subr.mxu1 %v1026_v11 }
0x1470   :  { %2341 = vmatpush3.msra.mxu1 %v1026_v11 }
0x1471   :  { %2342 = vmatprep.subr.mxu1 %v1025_v55 }
0x1472   :  { %797 = vrot.lane.b32.xlu0 %v2855_v10, %s2628_s1  ;;  %2343 = vmatpush3.msra.mxu1 %v1025_v55 }
0x1473   :  { %2344 = vmatprep.subr.mxu1 %v1024_v56 }
0x1474   :  { %2345 = vmatpush3.msra.mxu1 %v1024_v56 }
0x1475   :  { %2346 = vmatprep.subr.mxu1 %v1023_v2 }
0x1476   :  { %2347 = vmatpush3.msra.mxu1 %v1023_v2 }
0x1477   :  { %2362 = vmatprep.subr.mxu1 %v2625_v0 }
0x14dc   :  { %v1009_v4 = vpop.permute.xlu0 %1008 }
0x14dd   :  { %v1011_v60 = vmul.f32 %v1009_v4, %v1006_v57 }
0x14df   :  { %v1015_v6 = vadd.f32 %v1014_v59, %v1011_v60 }
0x14e0   :  { %v472_v61 = vpop.permute.xlu0 %471 }
0x14e1   :  { %475 = vst.msk [vmem:[#allocation2] sm:$0x30] %vm474_vm5, %v472_v61  ;;  %1017 = vrot.lane.b32.xlu0 %v1015_v6, %s2628_s1 }
0x14e4   :  { %v798_v8 = vpop.permute.xlu0 %797 }
0x14e5   :  { %800 = vst.msk [vmem:[#allocation2 + $0x8] sm:$0xc] %vm363_vm3, %v798_v8 }
0x14e8   :  { %v1021_v62 = vld [vmem:[#allocation2] sm:$0xff] }
0x14e9   :  { %2348 = vmatprep.mubr.msk.f32.mxu1 %vm70_vm1, %v1021_v62 }
0x151e   :  { %v1178_v63 = vpop.f32.mrf.mxu0 }
0x151f   :  { %1190 = vrot.lane.b32.xlu1 %v1178_v63, %s2627_s0 }
0x1520   :  { %v2361_v1 = vpop.f32.mrf.mxu0 }
0x1553   :  { %v1018_v3 = vpop.permute.xlu0 %1017 }
0x1554   :  { %1020 = vst.msk [vmem:[#allocation2 + $0x8] sm:$0xc0] %vm585_vm4, %v1018_v3 }
0x155b   :  { %v1022_v5 = vld [vmem:[#allocation2 + $0x8] sm:$0xff] }
0x155c   :  { %2349 = vmatmul.mubr.msk.f32.vlgmr.msra.gmra.mxu1 %vm70_vm1, %v1022_v5 }
0x155d   :  { %2363 = vmatpush3.msra.mxu1 %v2889_v52  ;;  %2370 = vmatprep.mubr.msk.f32.mxu1 %vm2626_vm0, %v2625_v0 }
0x155e   :  { %2364 = vmatprep.subr.mxu1 %v2625_v0 }
0x155f   :  { %2365 = vmatpush3.msra.mxu1 %v2891_v53 }
0x1560   :  { %2366 = vmatprep.subr.mxu1 %v2625_v0 }
0x1561   :  { %2367 = vmatpush3.msra.mxu1 %v2896_v13 }
0x1562   :  { %2368 = vmatprep.subr.mxu1 %v2625_v0 }
0x1563   :  { %2369 = vmatpush3.msra.mxu1 %v2900_v54 }
0x1564   :  { %2384 = vmatprep.subr.mxu1 %v2625_v0 }
0x1591   :  { %v1191_v17 = vpop.permute.xlu1 %1190 }
0x161c   :  { %v2942_v7 = vpop.f32.mrf.mxu1 }
0x161e   :  { %v2944_v9 = vpop.f32.mrf.mxu1 }
0x161f   :  { %v1182_v10 = vadd.f32 %v1178_v63, %v2944_v9 }
0x1621   :  { %v2125_v12 = vmul.f32 -1.442695, %v1182_v10 }
0x1623   :  { %2507 = vpow2.f32 %v2125_v12 }
0x1630   :  { %v2508_v15 = vpop.eup %2507 }
0x1631   :  { %v1186_v16 = vadd.f32 1.0, %v2508_v15 }
0x1633   :  { %2509 = vrcp.f32 %v1186_v16 }
0x1640   :  { %v2510_v18 = vpop.eup %2509 }
0x1641   :  { %v1193_v19 = vmul.f32 %v2510_v18, %v1191_v17  ;;  %v1200_v23 = vsub.f32 1.0, %v2510_v18  ;;  %v1206_v25 = vmul.f32 0.0, %v2510_v18 }
0x1643   :  { %1195 = vrot.lane.b32.xlu0 %v1193_v19, %s2627_s0 }
0x16b5   :  { %v1196_v20 = vpop.permute.xlu0 %1195 }
0x16b6   :  { %v1198_v21 = vadd.f32 %v1196_v20, %v2944_v9 }
0x16b8   :  { %2511 = vtanh.f32 %v1198_v21 }
0x16c5   :  { %v2512_v22 = vpop.eup %2511 }
0x16c6   :  { %1202 = vrot.lane.b32.xlu1 %v2512_v22, %s2628_s1 }
0x1738   :  { %v1203_v24 = vpop.permute.xlu1 %1202 }
0x1739   :  { %v1205_v26 = vmul.f32 %v1203_v24, %v1200_v23 }
0x173b   :  { %v1207_v27 = vadd.f32 %v1206_v25, %v1205_v26 }
0x173d   :  { %1209 = vrot.lane.b32.xlu0 %v1207_v27, %s2628_s1  ;;  %v1311_v42 = vrot.slane %v1207_v27, 6 }
0x17af   :  { %v1210_v28 = vpop.permute.xlu0 %1209 }
0x17b0   :  { %1212 = vst.msk [vmem:[#allocation2] sm:$0x3] %vm255_vm2, %v1210_v28  ;;  %2371 = vmatmul.mubr.msk.f32.vlgmr.msra.gmra.mxu1 %vm70_vm1, %v1210_v28 }
0x17b1   :  { %2385 = vmatpush3.msra.mxu1 %v2889_v52  ;;  %2392 = vmatprep.mubr.msk.f32.mxu1 %vm2626_vm0, %v2625_v0 }
0x17b2   :  { %2386 = vmatprep.subr.mxu1 %v2625_v0 }
0x17b3   :  { %2387 = vmatpush3.msra.mxu1 %v2891_v53 }
0x17b4   :  { %2388 = vmatprep.subr.mxu1 %v2625_v0 }
0x17b5   :  { %2389 = vmatpush3.msra.mxu1 %v2896_v13 }
0x17b6   :  { %2390 = vmatprep.subr.mxu1 %v2625_v0 }
0x17b7   :  { %2391 = vmatpush3.msra.mxu1 %v2900_v54 }
0x17b8   :  { %2406 = vmatprep.subr.mxu1 %v2625_v0 }
0x1870   :  { %v1281_v29 = vpop.f32.mrf.mxu1 }
0x1871   :  { %v1286_v30 = vrot.slane %v1281_v29, 6 }
0x1872   :  { %v2372_v31 = vpop.f32.mrf.mxu1 }
0x1873   :  { %1295 = vrot.lane.b32.xlu1 %v1286_v30, %s2627_s0  ;;  %v1288_v32 = vadd.f32 %v1286_v30, %v2944_v9 }
0x1875   :  { %v2127_v33 = vmul.f32 -1.442695, %v1288_v32 }
0x1877   :  { %2513 = vpow2.f32 %v2127_v33 }
0x1884   :  { %v2514_v35 = vpop.eup %2513 }
0x1885   :  { %v1292_v36 = vadd.f32 1.0, %v2514_v35 }
0x1887   :  { %2515 = vrcp.f32 %v1292_v36 }
0x1894   :  { %v2516_v14 = vpop.eup %2515 }
0x1895   :  { %v1305_v43 = vsub.f32 1.0, %v2516_v14  ;;  %v1313_v46 = vmul.f32 %v2516_v14, %v1311_v42 }
0x18e5   :  { %v1296_v37 = vpop.permute.xlu1 %1295 }
0x18e6   :  { %v1298_v38 = vmul.f32 %v2516_v14, %v1296_v37 }
0x18e8   :  { %1300 = vrot.lane.b32.xlu0 %v1298_v38, %s2627_s0 }
0x195a   :  { %v1301_v39 = vpop.permute.xlu0 %1300 }
0x195b   :  { %v1303_v40 = vadd.f32 %v1301_v39, %v2944_v9 }
0x195d   :  { %2517 = vtanh.f32 %v1303_v40 }
0x196a   :  { %v2518_v41 = vpop.eup %2517 }
0x196b   :  { %1307 = vrot.lane.b32.xlu1 %v2518_v41, %s2628_s1 }
0x19dd   :  { %v1308_v44 = vpop.permute.xlu1 %1307 }
0x19de   :  { %v1310_v45 = vmul.f32 %v1308_v44, %v1305_v43 }
0x19e0   :  { %v2968_v47 = vadd.f32 %v1313_v46, %v1310_v45 }
0x19e2   :  { %v1320_v48 = vrot.slane %v2968_v47, 2  ;;  %v1421_v8 = vrot.slane %v2968_v47, 6 }
0x19e4   :  { %1321 = vrot.lane.b32.xlu0 %v1320_v48, %s2628_s1 }
0x1a56   :  { %v1322_v50 = vpop.permute.xlu0 %1321 }
0x1a57   :  { %2382 = vmatmul.mubr.msk.f32.vlgmr.msra.gmra.mxu0 %vm70_vm1, %v1322_v50 }
0x1a58   :  { %2396 = vmatpush3.msra.mxu0 %v2889_v52  ;;  %2403 = vmatprep.mubr.msk.f32.mxu0 %vm2626_vm0, %v2625_v0 }
0x1a59   :  { %2397 = vmatprep.subr.mxu0 %v2625_v0 }
0x1a5a   :  { %2398 = vmatpush3.msra.mxu0 %v2891_v53 }
0x1a5b   :  { %2399 = vmatprep.subr.mxu0 %v2625_v0 }
0x1a5c   :  { %2400 = vmatpush3.msra.mxu0 %v2896_v13 }
0x1a5d   :  { %2401 = vmatprep.subr.mxu0 %v2625_v0 }
0x1a5e   :  { %2402 = vmatpush3.msra.mxu0 %v2900_v54 }
0x1a5f   :  { %2417 = vmatprep.subr.mxu0 %v2625_v0 }
0x1b17   :  { %v1391_v51 = vpop.f32.mrf.mxu0 }
0x1b18   :  { %v1396_v49 = vrot.slane %v1391_v51, 4 }
0x1b19   :  { %v2383_v34 = vpop.f32.mrf.mxu0 }
0x1b1a   :  { %1405 = vrot.lane.b32.xlu1 %v1396_v49, %s2627_s0  ;;  %v1398_v11 = vadd.f32 %v1396_v49, %v2944_v9 }
0x1b1c   :  { %v2129_v55 = vmul.f32 -1.442695, %v1398_v11 }
0x1b1e   :  { %2519 = vpow2.f32 %v2129_v55 }
0x1b2b   :  { %v2520_v56 = vpop.eup %2519 }
0x1b2c   :  { %v1402_v2 = vadd.f32 1.0, %v2520_v56 }
0x1b2e   :  { %2521 = vrcp.f32 %v1402_v2 }
0x1b3b   :  { %v2522_v57 = vpop.eup %2521 }
0x1b3c   :  { %v1415_v61 = vsub.f32 1.0, %v2522_v57  ;;  %v1423_v63 = vmul.f32 %v2522_v57, %v1421_v8 }
0x1b8c   :  { %v1406_v58 = vpop.permute.xlu1 %1405 }
0x1b8d   :  { %v1408_v4 = vmul.f32 %v2522_v57, %v1406_v58 }
0x1b8f   :  { %1410 = vrot.lane.b32.xlu0 %v1408_v4, %s2627_s0 }
0x1c01   :  { %v1411_v59 = vpop.permute.xlu0 %1410 }
0x1c02   :  { %v1413_v60 = vadd.f32 %v1411_v59, %v2944_v9 }
0x1c04   :  { %2523 = vtanh.f32 %v1413_v60 }
0x1c11   :  { %v2524_v6 = vpop.eup %2523 }
0x1c12   :  { %1417 = vrot.lane.b32.xlu1 %v2524_v6, %s2628_s1 }
0x1c84   :  { %v1418_v62 = vpop.permute.xlu1 %1417 }
0x1c85   :  { %v1420_v1 = vmul.f32 %v1418_v62, %v1415_v61 }
0x1c87   :  { %v2989_v3 = vadd.f32 %v1423_v63, %v1420_v1 }
0x1c89   :  { %v1430_v5 = vrot.slane %v2989_v3, 4  ;;  %v1531_v28 = vrot.slane %v2989_v3, 6 }
0x1c8b   :  { %1431 = vrot.lane.b32.xlu0 %v1430_v5, %s2628_s1 }
0x1cfd   :  { %v1432_v10 = vpop.permute.xlu0 %1431 }
0x1cfe   :  { %2393 = vmatmul.mubr.msk.f32.vlgmr.msra.gmra.mxu1 %vm70_vm1, %v1432_v10 }
0x1cff   :  { %2407 = vmatpush3.msra.mxu1 %v2889_v52  ;;  %2414 = vmatprep.mubr.msk.f32.mxu1 %vm2626_vm0, %v2625_v0 }
0x1d00   :  { %2408 = vmatprep.subr.mxu1 %v2625_v0 }
0x1d01   :  { %2409 = vmatpush3.msra.mxu1 %v2891_v53 }
0x1d02   :  { %2410 = vmatprep.subr.mxu1 %v2625_v0 }
0x1d03   :  { %2411 = vmatpush3.msra.mxu1 %v2896_v13 }
0x1d04   :  { %2412 = vmatprep.subr.mxu1 %v2625_v0 }
0x1d05   :  { %2413 = vmatpush3.msra.mxu1 %v2900_v54 }
0x1d06   :  { %2428 = vmatprep.subr.mxu1 %v2625_v0 }
0x1dbe   :  { %v1501_v12 = vpop.f32.mrf.mxu1 }
0x1dbf   :  { %v1506_v15 = vrot.slane %v1501_v12, 2 }
0x1dc0   :  { %v2394_v16 = vpop.f32.mrf.mxu1 }
0x1dc1   :  { %1515 = vrot.lane.b32.xlu1 %v1506_v15, %s2627_s0  ;;  %v1508_v17 = vadd.f32 %v1506_v15, %v2944_v9 }
0x1dc3   :  { %v2131_v18 = vmul.f32 -1.442695, %v1508_v17 }
0x1dc5   :  { %2525 = vpow2.f32 %v2131_v18 }
0x1dd2   :  { %v2526_v19 = vpop.eup %2525 }
0x1dd3   :  { %v1512_v20 = vadd.f32 1.0, %v2526_v19 }
0x1dd5   :  { %2527 = vrcp.f32 %v1512_v20 }
0x1de2   :  { %v2528_v21 = vpop.eup %2527 }
0x1de3   :  { %v1525_v27 = vsub.f32 1.0, %v2528_v21  ;;  %v1533_v30 = vmul.f32 %v2528_v21, %v1531_v28 }
0x1e33   :  { %v1516_v22 = vpop.permute.xlu1 %1515 }
0x1e34   :  { %v1518_v23 = vmul.f32 %v2528_v21, %v1516_v22 }
0x1e36   :  { %1520 = vrot.lane.b32.xlu0 %v1518_v23, %s2627_s0 }
0x1ea8   :  { %v1521_v24 = vpop.permute.xlu0 %1520 }
0x1ea9   :  { %v1523_v25 = vadd.f32 %v1521_v24, %v2944_v9 }
0x1eab   :  { %2529 = vtanh.f32 %v1523_v25 }
0x1eb8   :  { %v2530_v26 = vpop.eup %2529 }
0x1eb9   :  { %1527 = vrot.lane.b32.xlu1 %v2530_v26, %s2628_s1 }
0x1f2b   :  { %v1528_v29 = vpop.permute.xlu1 %1527 }
0x1f2c   :  { %v1530_v31 = vmul.f32 %v1528_v29, %v1525_v27 }
0x1f2e   :  { %v3010_v32 = vadd.f32 %v1533_v30, %v1530_v31 }
0x1f30   :  { %v1540_v33 = vrot.slane %v3010_v32, 6 }
0x1f32   :  { %1541 = vrot.lane.b32.xlu0 %v1540_v33, %s2628_s1 }
0x1fa4   :  { %v1542_v35 = vpop.permute.xlu0 %1541 }
0x1fa5   :  { %2404 = vmatmul.mubr.msk.f32.vlgmr.msra.gmra.mxu0 %vm70_vm1, %v1542_v35 }
0x1fa6   :  { %2418 = vmatpush3.msra.mxu0 %v2889_v52  ;;  %2425 = vmatprep.mubr.msk.f32.mxu0 %vm2626_vm0, %v2625_v0 }
0x1fa7   :  { %2419 = vmatprep.subr.mxu0 %v2625_v0 }
0x1fa8   :  { %2420 = vmatpush3.msra.mxu0 %v2891_v53 }
0x1fa9   :  { %2421 = vmatprep.subr.mxu0 %v2625_v0 }
0x1faa   :  { %2422 = vmatpush3.msra.mxu0 %v2896_v13 }
0x1fab   :  { %2423 = vmatprep.subr.mxu0 %v2625_v0 }
0x1fac   :  { %2424 = vmatpush3.msra.mxu0 %v2900_v54 }
0x2065   :  { %v1611_v9 = vpop.f32.mrf.mxu0 }
0x2066   :  { %1623 = vrot.lane.b32.xlu1 %v1611_v9, %s2627_s0  ;;  %v1615_v14 = vadd.f32 %v2942_v7, %v1611_v9 }
0x2067   :  { %v2405_v36 = vpop.f32.mrf.mxu0 }
0x2068   :  { %v2133_v37 = vmul.f32 -1.442695, %v1615_v14 }
0x206a   :  { %2531 = vpow2.f32 %v2133_v37 }
0x2077   :  { %v2532_v38 = vpop.eup %2531 }
0x2078   :  { %v1619_v39 = vadd.f32 1.0, %v2532_v38 }
0x207a   :  { %2533 = vrcp.f32 %v1619_v39 }
0x2087   :  { %v2534_v40 = vpop.eup %2533 }
0x2088   :  { %v1633_v46 = vsub.f32 1.0, %v2534_v40  ;;  %v1640_v50 = vmul.f32 %v2534_v40, %v1540_v33 }
0x20d8   :  { %v1624_v41 = vpop.permute.xlu1 %1623 }
0x20d9   :  { %v1626_v42 = vmul.f32 %v2534_v40, %v1624_v41 }
0x20db   :  { %1628 = vrot.lane.b32.xlu0 %v1626_v42, %s2627_s0 }
0x214d   :  { %v1629_v43 = vpop.permute.xlu0 %1628 }
0x214e   :  { %v1631_v44 = vadd.f32 %v2942_v7, %v1629_v43 }
0x2150   :  { %2535 = vtanh.f32 %v1631_v44 }
0x215d   :  { %v2536_v45 = vpop.eup %2535 }
0x215e   :  { %1635 = vrot.lane.b32.xlu1 %v2536_v45, %s2628_s1 }
0x21d0   :  { %v1636_v48 = vpop.permute.xlu1 %1635 }
0x21d1   :  { %v1638_v51 = vmul.f32 %v1636_v48, %v1633_v46 }
0x21d3   :  { %v1641_v49 = vadd.f32 %v1640_v50, %v1638_v51 }
0x21d5   :  { %1643 = vrot.lane.b32.xlu0 %v1641_v49, %s2628_s1  ;;  %v1745_v60 = vrot.slane %v1641_v49, 6 }
0x2247   :  { %v1644_v34 = vpop.permute.xlu0 %1643 }
0x2248   :  { %1646 = vst.msk [vmem:[#allocation2 + $0x8] sm:$0x3] %vm255_vm2, %v1644_v34  ;;  %2415 = vmatmul.mubr.msk.f32.vlgmr.msra.gmra.mxu1 %vm70_vm1, %v1644_v34 }
0x2249   :  { %2429 = vmatpush3.msra.mxu1 %v2889_v52  ;;  %2436 = vmatprep.mubr.msk.f32.mxu1 %vm2626_vm0, %v2625_v0 }
0x224a   :  { %2430 = vmatprep.subr.mxu1 %v2625_v0 }
0x224b   :  { %2431 = vmatpush3.msra.mxu1 %v2891_v53 }
0x224c   :  { %2432 = vmatprep.subr.mxu1 %v2625_v0 }
0x224d   :  { %2433 = vmatpush3.msra.mxu1 %v2896_v13 }
0x224e   :  { %2434 = vmatprep.subr.mxu1 %v2625_v0 }
0x224f   :  { %2435 = vmatpush3.msra.mxu1 %v2900_v54 }
0x2308   :  { %v1715_v11 = vpop.f32.mrf.mxu1 }
0x2309   :  { %v1720_v55 = vrot.slane %v1715_v11, 6 }
0x230a   :  { %v2416_v56 = vpop.f32.mrf.mxu1 }
0x230b   :  { %1729 = vrot.lane.b32.xlu1 %v1720_v55, %s2627_s0  ;;  %v1722_v52 = vadd.f32 %v2942_v7, %v1720_v55 }
0x230d   :  { %v2135_v2 = vmul.f32 -1.442695, %v1722_v52 }
0x230f   :  { %2537 = vpow2.f32 %v2135_v2 }
0x231c   :  { %v2538_v57 = vpop.eup %2537 }
0x231d   :  { %v1726_v58 = vadd.f32 1.0, %v2538_v57 }
0x231f   :  { %2539 = vrcp.f32 %v1726_v58 }
0x232c   :  { %v2540_v53 = vpop.eup %2539 }
0x232d   :  { %v1739_v6 = vsub.f32 1.0, %v2540_v53  ;;  %v1747_v62 = vmul.f32 %v2540_v53, %v1745_v60 }
0x237d   :  { %v1730_v4 = vpop.permute.xlu1 %1729 }
0x237e   :  { %v1732_v59 = vmul.f32 %v2540_v53, %v1730_v4 }
0x2380   :  { %1734 = vrot.lane.b32.xlu0 %v1732_v59, %s2627_s0 }
0x23f2   :  { %v1735_v0 = vpop.permute.xlu0 %1734 }
0x23f3   :  { %v1737_v13 = vadd.f32 %v2942_v7, %v1735_v0  ;;  %v2142_v0 = vld [vmem:[%s3101_s6] ss:$0 sm:$0xff]  ;;  %s2629_s6 = smov [#allocation8]  }
0x23f4   :  { %s2096_s15 = sshll.u32 %s2629_s6, 4  ;;  %s2097_s15 = int_to_ptr.vmem [resolvable:$true] %s2096_s15 }
0x23f5   :  { %2541 = vtanh.f32 %v1737_v13  ;;  %s2595_s4 = scalar_lea.vmem %s2097_s15, 32  ;;  %p2600_p11 = scmp.lt.s32.totalorder %s2097_s15, %s2097_s15 }
0x23f6   :  { %p2596_p10 = scmp.ne.s32.totalorder %s2097_s15, %s2595_s4  ;;  %p2601_p12 = scmp.lt.s32.totalorder %s2595_s4, %s2595_s4 }
0x23f8   :  { %p2602_p13 = por %p2601_p12, %p2600_p11 }
0x23fa   :  { %p2603_p0 = pnand %p2602_p13, %p2596_p10 }
0x2402   :  { %v2542_v54 = vpop.eup %2541 }
0x2403   :  { %1741 = vrot.lane.b32.xlu1 %v2542_v54, %s2628_s1 }
0x2475   :  { %v1742_v61 = vpop.permute.xlu1 %1741 }
0x2476   :  { %v1744_v8 = vmul.f32 %v1742_v61, %v1739_v6 }
0x2478   :  { %v1748_v63 = vadd.f32 %v1747_v62, %v1744_v8 }
0x247a   :  { %v1754_v1 = vrot.slane %v1748_v63, 2  ;;  %v1855_v27 = vrot.slane %v1748_v63, 6 }
0x247c   :  { %1755 = vrot.lane.b32.xlu0 %v1754_v1, %s2628_s1 }
0x24ee   :  { %v1756_v5 = vpop.permute.xlu0 %1755 }
0x24ef   :  { %2426 = vmatmul.mubr.msk.f32.vlgmr.msra.gmra.mxu0 %vm70_vm1, %v1756_v5 }
0x25af   :  { %v1825_v10 = vpop.f32.mrf.mxu0 }
0x25b0   :  { %v1830_v12 = vrot.slane %v1825_v10, 4 }
0x25b1   :  { %v2427_v15 = vpop.f32.mrf.mxu0 }
0x25b2   :  { %1839 = vrot.lane.b32.xlu1 %v1830_v12, %s2627_s0  ;;  %v1832_v16 = vadd.f32 %v2942_v7, %v1830_v12 }
0x25b4   :  { %v2137_v17 = vmul.f32 -1.442695, %v1832_v16 }
0x25b6   :  { %2543 = vpow2.f32 %v2137_v17 }
0x25c3   :  { %v2544_v18 = vpop.eup %2543 }
0x25c4   :  { %v1836_v19 = vadd.f32 1.0, %v2544_v18 }
0x25c6   :  { %2545 = vrcp.f32 %v1836_v19 }
0x25d3   :  { %v2546_v20 = vpop.eup %2545 }
0x25d4   :  { %v1849_v26 = vsub.f32 1.0, %v2546_v20  ;;  %v1857_v29 = vmul.f32 %v2546_v20, %v1855_v27 }
0x2624   :  { %v1840_v21 = vpop.permute.xlu1 %1839 }
0x2625   :  { %v1842_v22 = vmul.f32 %v2546_v20, %v1840_v21 }
0x2627   :  { %1844 = vrot.lane.b32.xlu0 %v1842_v22, %s2627_s0 }
0x2699   :  { %v1845_v23 = vpop.permute.xlu0 %1844 }
0x269a   :  { %v1847_v24 = vadd.f32 %v2942_v7, %v1845_v23 }
0x269c   :  { %2547 = vtanh.f32 %v1847_v24 }
0x26a9   :  { %v2548_v25 = vpop.eup %2547 }
0x26aa   :  { %1851 = vrot.lane.b32.xlu1 %v2548_v25, %s2628_s1 }
0x271c   :  { %v1852_v28 = vpop.permute.xlu1 %1851 }
0x271d   :  { %v1854_v30 = vmul.f32 %v1852_v28, %v1849_v26 }
0x271f   :  { %v1858_v31 = vadd.f32 %v1857_v29, %v1854_v30 }
0x2721   :  { %v1864_v33 = vrot.slane %v1858_v31, 4  ;;  %v1965_v34 = vrot.slane %v1858_v31, 6 }
0x2723   :  { %1865 = vrot.lane.b32.xlu0 %v1864_v33, %s2628_s1 }
0x2795   :  { %v1866_v35 = vpop.permute.xlu0 %1865 }
0x2796   :  { %2437 = vmatmul.mubr.msk.f32.vlgmr.msra.gmra.mxu1 %vm70_vm1, %v1866_v35 }
0x2856   :  { %v1935_v9 = vpop.f32.mrf.mxu1 }
0x2857   :  { %v1940_v36 = vrot.slane %v1935_v9, 2 }
0x2858   :  { %v2438_v14 = vpop.f32.mrf.mxu1 }
0x2859   :  { %1949 = vrot.lane.b32.xlu1 %v1940_v36, %s2627_s0  ;;  %v1942_v37 = vadd.f32 %v2942_v7, %v1940_v36 }
0x285b   :  { %v2139_v38 = vmul.f32 -1.442695, %v1942_v37 }
0x285d   :  { %2549 = vpow2.f32 %v2139_v38 }
0x286a   :  { %v2550_v39 = vpop.eup %2549 }
0x286b   :  { %v1946_v40 = vadd.f32 1.0, %v2550_v39 }
0x286d   :  { %2551 = vrcp.f32 %v1946_v40 }
0x287a   :  { %v2552_v41 = vpop.eup %2551 }
0x287b   :  { %v1959_v49 = vsub.f32 1.0, %v2552_v41  ;;  %v1967_v55 = vmul.f32 %v2552_v41, %v1965_v34 }
0x28cb   :  { %v1950_v42 = vpop.permute.xlu1 %1949 }
0x28cc   :  { %v1952_v43 = vmul.f32 %v2552_v41, %v1950_v42 }
0x28ce   :  { %1954 = vrot.lane.b32.xlu0 %v1952_v43, %s2627_s0 }
0x28d2   :  { %1316 = vrot.lane.b32.xlu0 %v2968_v47, %s2628_s1  ;;  %v57_v47 = vld [vmem:[%s3100_s5 + $0x10] sm:$0xff] }
0x28d6   :  { %1536 = vrot.lane.b32.xlu0 %v3010_v32, %s2628_s1  ;;  %v56_v32 = vld [vmem:[%s3100_s5 + $0x8] sm:$0xff] }
0x28da   :  { %1860 = vrot.lane.b32.xlu0 %v1858_v31, %s2628_s1 }
0x2940   :  { %v1955_v44 = vpop.permute.xlu0 %1954 }
0x2941   :  { %v1957_v45 = vadd.f32 %v2942_v7, %v1955_v44  ;;  %v58_v7 = vld [vmem:[%s3100_s5 + $0x18] sm:$0xff] }
0x2942   :  { %2439 = vmatprep.subr.mxu0 %v58_v7 }
0x2943   :  { %2553 = vtanh.f32 %v1957_v45  ;;  %2440 = vmatpush3.msra.mxu0 %v58_v7 }
0x2944   :  { %v1317_v46 = vpop.permute.xlu0 %1316  ;;  %2441 = vmatprep.subr.mxu0 %v57_v47 }
0x2945   :  { %1319 = vst.msk [vmem:[#allocation2] sm:$0xc] %vm363_vm3, %v1317_v46  ;;  %2442 = vmatpush3.msra.mxu0 %v57_v47 }
0x2946   :  { %2443 = vmatprep.subr.mxu0 %v56_v32 }
0x2947   :  { %2444 = vmatpush3.msra.mxu0 %v56_v32 }
0x2948   :  { %v1537_v48 = vpop.permute.xlu0 %1536 }
0x2949   :  { %1539 = vst.msk [vmem:[#allocation2] sm:$0xc0] %vm585_vm4, %v1537_v48 }
0x294c   :  { %v1861_v50 = vpop.permute.xlu0 %1860 }
0x294d   :  { %1863 = vst.msk [vmem:[#allocation2 + $0x8] sm:$0x30] %vm474_vm5, %v1861_v50 }
0x2950   :  { %v2554_v51 = vpop.eup %2553 }
0x2951   :  { %1961 = vrot.lane.b32.xlu1 %v2554_v51, %s2628_s1 }
0x2955   :  { %1426 = vrot.lane.b32.xlu1 %v2989_v3, %s2628_s1  ;;  %v55_v3 = vld [vmem:[%s3100_s5] sm:$0xff] }
0x2956   :  { %2445 = vmatprep.subr.mxu0 %v55_v3 }
0x2957   :  { %2446 = vmatpush3.msra.mxu0 %v55_v3 }
0x2959   :  { %1750 = vrot.lane.b32.xlu1 %v1748_v63, %s2628_s1 }
0x29c3   :  { %v1962_v11 = vpop.permute.xlu1 %1961 }
0x29c4   :  { %v1964_v56 = vmul.f32 %v1962_v11, %v1959_v49 }
0x29c6   :  { %v1968_v52 = vadd.f32 %v1967_v55, %v1964_v56 }
0x29c7   :  { %v1427_v2 = vpop.permute.xlu1 %1426 }
0x29c8   :  { %1429 = vst.msk [vmem:[#allocation2] sm:$0x30] %vm474_vm5, %v1427_v2  ;;  %1970 = vrot.lane.b32.xlu1 %v1968_v52, %s2628_s1 }
0x29cb   :  { %v1751_v57 = vpop.permute.xlu1 %1750 }
0x29cc   :  { %1753 = vst.msk [vmem:[#allocation2 + $0x8] sm:$0xc] %vm363_vm3, %v1751_v57 }
0x29cf   :  { %v1974_v58 = vld [vmem:[#allocation2] sm:$0xff] }
0x29d0   :  { %2447 = vmatprep.mubr.msk.f32.mxu0 %vm70_vm1, %v1974_v58 }
0x2a3a   :  { %v1971_v53 = vpop.permute.xlu1 %1970 }
0x2a3b   :  { %1973 = vst.msk [vmem:[#allocation2 + $0x8] sm:$0xc0] %vm585_vm4, %v1971_v53 }
0x2a42   :  { %v1975_v4 = vld [vmem:[#allocation2 + $0x8] sm:$0xff] }
0x2a43   :  { %2448 = vmatmul.mubr.msk.f32.vlgmr.msra.gmra.mxu0 %vm70_vm1, %v1975_v4 }
0x2b03   :  { %v2449_v59 = vpop.f32.mrf.mxu0 }
0x2b04   :  { %v2058_v13 = vmax.f32 %v2449_v59, 0.0 }
0x2b05   :  { %v2048_v54 = vpop.f32.mrf.mxu0 }
0x2b06   :  { %v2057_v60 = vmax.f32 %v2048_v54, 0.0  ;;  %v2066_v6 = vmul.f32 %v2142_v0, %v2058_v13 }
0x2b08   :  { %v2065_v61 = vmul.f32 %v2142_v0, %v2057_v60  ;;  %v2071_v8 = vsel %vm2067_vm6, %v2066_v6, 0.0 }
0x2b09   :  { %2072 = vadd.xlane.f32.xlu1 %v2071_v8 }
0x2b0a   :  { %v2068_v62 = vsel %vm2067_vm6, %v2065_v61, 0.0 }
0x2b0b   :  { %2069 = vadd.xlane.f32.xlu0 %v2068_v62 }
0x2b92   :  { %v2073_v1 = vpop.xlane.xlu1 %2072 }
0x2b94   :  { %v2070_v63 = vpop.xlane.xlu0 %2069 }
0x2b95   :  { %2075 = vst.msk [vmem:[#allocation8] sm:$0x3] %vm2074_vm7, %v2070_v63 }
0x2b96   :  { %2077 = vst.msk [vmem:[#allocation8 - $0x2] sm:$0xc] %vm2076_vm8, %v2070_v63 }
0x2b97   :  { %2079 = vst.msk [vmem:[#allocation8 - $0x4] sm:$0x30] %vm2078_vm9, %v2070_v63 }
0x2b98   :  { %2081 = vst.msk [vmem:[#allocation8 - $0x6] sm:$0xc0] %vm2080_vm10, %v2070_v63 }
0x2b99   :  { %2083 = vst.msk [vmem:[#allocation8] sm:$0x3] %vm2082_vm11, %v2073_v1 }
0x2b9a   :  { %2085 = vst.msk [vmem:[#allocation8 - $0x2] sm:$0xc] %vm2084_vm12, %v2073_v1 }
0x2b9b   :  { %2087 = vst.msk [vmem:[#allocation8 - $0x4] sm:$0x30] %vm2086_vm13, %v2073_v1 }
0x2b9c   :  { %2089 = vst.msk [vmem:[#allocation8 - $0x6] sm:$0xc0] %vm2088_vm14, %v2073_v1 }
0x2b9d   :  { %2606 = shalt.err (!%p2603_p0)
}
0x2b9e   :  { %2099 = dma.vmem_to_hbm [thread:$0]  %s2097_s15, 32, %s3102_s7, [#allocation5]  }
0x2b9f   :  { %2619 = dma.done.wait [#allocation5], 32  }
0x2ba0   :  { %2620 = vsyncadd [#allocation5], 4294967264 }
0x2ba1   :  { %2103 = vsyncpa [#allocation4], 1 }
0x2ba2   :  { %2104 = vsyncpa [#allocation7], 1 }
0x2ba3   :  { %2105 = vsyncpa [#allocation5], 1 }

</bundles_post_ra>
